<compile_context>
chip_gen: v6e
topology: v6e:2x2x1
jax: 0.10.0
libtpu: 0.0.40
codegen_flags: <defaults>
</compile_context>

<pallas_src>
import functools

import numpy as np
import jax
import jax.numpy as jnp
from jax.experimental import pallas as pl
from jax.experimental.pallas import tpu as pltpu


# ---------------------------------------------------------------------------
# Helpers
# ---------------------------------------------------------------------------
def upsample_matrix(n: int) -> np.ndarray:
    """(2n, n) matrix for 1-D bilinear x2 upsample, align_corners=False
    (PyTorch F.interpolate semantics, incl. boundary clamping).
    Used only by the pure-JAX reference."""
    L = 2 * n
    o = np.arange(L, dtype=np.float64)
    src = (o + 0.5) / 2.0 - 0.5
    src = np.maximum(src, 0.0)
    i0 = np.minimum(np.floor(src).astype(np.int64), n - 1)
    frac = src - i0
    i1 = np.minimum(i0 + 1, n - 1)
    M = np.zeros((L, n), dtype=np.float32)
    M[np.arange(L), i0] += (1.0 - frac).astype(np.float32)
    M[np.arange(L), i1] += frac.astype(np.float32)
    return M


def _pick_row_tile(rh: int, cap: int = 64) -> int:
    """Largest multiple of 8 that divides rh and is <= cap; fall back to rh."""
    best = rh
    tr = 8
    while tr <= min(rh, cap):
        if rh % tr == 0:
            best = tr
        tr += 8
    return best


# ---------------------------------------------------------------------------
# Fused kernel: pre_conv + bilinear x2 + weighted fusion + post_conv
# ---------------------------------------------------------------------------
def make_wf_kernel(eps, RH, RW, Cd, Cin, TR):
    TRF = TR + 2          # fused rows per tile (1-row halo each side for post_conv)
    TRH = TR // 2 + 1     # low-res rows feeding the H-direction upsample of a tile

    def kernel(fw_ref, res_ref, xw_ref, wpre_ref, wpost_ref, out_ref, res_pad_ref):
        t = pl.program_id(1)

        # ---- once per image (t == 0): row-padded copy of res in VMEM -------
        # (zero padding handled in-kernel; no jnp.pad HBM round trip)
        @pl.when(t == 0)
        def _():
            res_pad_ref[...] = jnp.zeros((RH + 4, RW, Cin), jnp.float32)
            res_pad_ref[2:RH + 2, :, :] = res_ref[0]

        # ---- relu-normalized fusion weights (scalars from SMEM) ------------
        w0 = jnp.maximum(fw_ref[0], 0.0)
        w1 = jnp.maximum(fw_ref[1], 0.0)
        inv = 1.0 / (w0 + w1 + eps)
        w0n = w0 * inv
        w1n = w1 * inv

        r0 = pl.multiple_of(t * TR, TR)   # first output row of this tile
        i0 = t * (TR // 2)                # first low-res row feeding the tile

        # ---- bilinear x2 upsample, H direction: pure VPU shifted adds ------
        # xw_ref holds the W-upsampled x with one replicated row top & bottom,
        # so the PyTorch edge clamp is just an index shift.
        p = xw_ref[0, pl.ds(i0, TRH), :, :]        # x_up rows i0-1 .. i0+TR/2
        q = xw_ref[0, pl.ds(i0 + 1, TRH), :, :]    # x_up rows i0   .. i0+TR/2+1
        u_even = 0.75 * p + 0.25 * q               # fused-slab rows 0,2,4,...
        u_odd = 0.25 * p + 0.75 * q                # fused-slab rows 1,3,5,...
        up = jnp.concatenate(
            [u_even[:, None, :, :], u_odd[:, None, :, :]], axis=1
        ).reshape(TRF, RW, Cd)                     # upsampled rows r0-1 .. r0+TR

        # ---- pre_conv(res) on the tile: 9-tap im2col -> one MXU matmul ------
        rows = res_pad_ref[pl.ds(r0, TRF + 2), :, :]            # (TRF+2, RW, Cin)
        zc_r = jnp.zeros((TRF + 2, 1, Cin), jnp.float32)
        rpad = jnp.concatenate([zc_r, rows, zc_r], axis=1)      # (TRF+2, RW+2, Cin)
        taps = []
        for dy in range(3):
            for dx in range(3):
                taps.append(rpad[dy:dy + TRF, dx:dx + RW, :].reshape(TRF * RW, Cin))
        patches = jnp.concatenate(taps, axis=-1)                # (TRF*RW, 9*Cin)
        pre = jnp.dot(patches, wpre_ref[...],
                      preferred_element_type=jnp.float32)
        pre = pre.reshape(TRF, RW, Cd)

        # ---- weighted fusion; zero halo rows that fall outside the image ----
        frow = r0 - 1 + jax.lax.broadcasted_iota(jnp.int32, (TRF, 1, 1), 0)
        rmask = jnp.logical_and(frow >= 0, frow < RH).astype(jnp.float32)
        fused = rmask * (w0n * pre + w1n * up)                  # (TRF, RW, Cd)

        # ---- post_conv applied while the fused tile is still in VMEM --------
        zc_f = jnp.zeros((TRF, 1, Cd), jnp.float32)
        fpad = jnp.concatenate([zc_f, fused, zc_f], axis=1)     # (TRF, RW+2, Cd)
        taps2 = []
        for dy in range(3):
            for dx in range(3):
                taps2.append(fpad[dy:dy + TR, dx:dx + RW, :].reshape(TR * RW, Cd))
        patches2 = jnp.concatenate(taps2, axis=-1)              # (TR*RW, 9*Cd)
        out = jnp.dot(patches2, wpost_ref[...],
                      preferred_element_type=jnp.float32)

        # NOTE: with the module's real decode_channels=128 the minor dim of this
        # store is already lane-dense; for tiny Cd a (W,Cd)->lanes collapse would
        # be the further optimization.
        out_ref[0] = out.reshape(TR, RW, Cd)

    return kernel


# ---------------------------------------------------------------------------
# Wrapper (public API: NCHW in / NCHW out, like the PyTorch module)
# ---------------------------------------------------------------------------
@functools.partial(jax.jit, static_argnames=("eps", "row_tile"))
def wf_forward(x_nchw, res_nchw, w_pre, w_post, fuse_raw, eps=1e-8, row_tile=None):
    """x_nchw: (B, Cd, H, W); res_nchw: (B, Cin, 2H, 2W);
    w_pre: (3,3,Cin,Cd) HWIO; w_post: (3,3,Cd,Cd) HWIO; fuse_raw: (2,).
    Returns (B, Cd, 2H, 2W) NCHW."""
    x = jnp.transpose(x_nchw, (0, 2, 3, 1)).astype(jnp.float32)      # (B,H,W,Cd)
    res = jnp.transpose(res_nchw, (0, 2, 3, 1)).astype(jnp.float32)  # (B,RH,RW,Cin)
    B, H, W, Cd = x.shape
    _, RH, RW, Cin = res.shape                                       # RH=2H, RW=2W

    TR = _pick_row_tile(RH) if row_tile is None else int(row_tile)
    assert RH % TR == 0 and TR % 2 == 0 and (TR % 8 == 0 or TR == RH)
    n_tiles = RH // TR

    # W-direction bilinear x2 (taps 0.25/0.75, edge clamped) on the *small* low-res
    # x via shifted adds, plus one replicated row top & bottom so the in-kernel
    # H-direction taps reduce to plain dynamic row slices.
    left = jnp.concatenate([x[:, :, :1, :], x[:, :, :W - 1, :]], axis=2)
    right = jnp.concatenate([x[:, :, 1:, :], x[:, :, W - 1:, :]], axis=2)
    even = 0.25 * left + 0.75 * x
    odd = 0.75 * x + 0.25 * right
    xw = jnp.stack([even, odd], axis=3).reshape(B, H, RW, Cd)
    xw = jnp.concatenate([xw[:, :1], xw, xw[:, H - 1:]], axis=1)     # (B, H+2, RW, Cd)

    # OREPA collapsed to single 3x3 convs; HWIO -> (9*Cin, Cout) matching the
    # in-kernel im2col tap order (dy outer, dx inner, cin minor).
    wpre2 = w_pre.astype(jnp.float32).reshape(9 * Cin, Cd)
    wpost2 = w_post.astype(jnp.float32).reshape(9 * Cd, Cd)

    kernel = make_wf_kernel(eps, RH, RW, Cd, Cin, TR)

    out = pl.pallas_call(
        kernel,
        out_shape=jax.ShapeDtypeStruct((B, RH, RW, Cd), jnp.float32),
        grid=(B, n_tiles),
        in_specs=[
            pl.BlockSpec(memory_space=pltpu.MemorySpace.SMEM),            # fuse_raw (2,)
            pl.BlockSpec((1, RH, RW, Cin), lambda b, t: (b, 0, 0, 0)),    # res (1 DMA/image)
            pl.BlockSpec((1, H + 2, RW, Cd), lambda b, t: (b, 0, 0, 0)),  # W-upsampled x
            pl.BlockSpec((9 * Cin, Cd), lambda b, t: (0, 0)),             # pre_conv weight
            pl.BlockSpec((9 * Cd, Cd), lambda b, t: (0, 0)),              # post_conv weight
        ],
        out_specs=pl.BlockSpec((1, TR, RW, Cd), lambda b, t: (b, t, 0, 0)),
        scratch_shapes=[pltpu.VMEM((RH + 4, RW, Cin), jnp.float32)],      # row-padded res
        compiler_params=pltpu.CompilerParams(
            dimension_semantics=("parallel", "arbitrary"),
            vmem_limit_bytes=48 * 1024 * 1024),
    )(fuse_raw.astype(jnp.float32), res, xw, wpre2, wpost2)

    return jnp.transpose(out, (0, 3, 1, 2))                          # back to NCHW


# ---------------------------------------------------------------------------
# Pure-JAX reference (correctness check)
# ---------------------------------------------------------------------------
def wf_reference(x_nchw, res_nchw, w_pre, w_post, fuse_raw, eps=1e-8):
    x = jnp.transpose(x_nchw, (0, 2, 3, 1)).astype(jnp.float32)
    res = jnp.transpose(res_nchw, (0, 2, 3, 1)).astype(jnp.float32)
    B, H, W, Cd = x.shape

    def conv(inp, w):
        return jax.lax.conv_general_dilated(
            inp, w, window_strides=(1, 1), padding="SAME",
            dimension_numbers=("NHWC", "HWIO", "NHWC"),
            precision=jax.lax.Precision.HIGHEST)

    Uh = jnp.asarray(upsample_matrix(H))
    Uw = jnp.asarray(upsample_matrix(W))
    up = jnp.einsum('oh,bhwc->bowc', Uh, x, precision=jax.lax.Precision.HIGHEST)
    up = jnp.einsum('pw,bowc->bopc', Uw, up, precision=jax.lax.Precision.HIGHEST)

    w = jnp.maximum(fuse_raw, 0.0)
    fw = w / (jnp.sum(w) + eps)
    fused = fw[0] * conv(res, w_pre) + fw[1] * up
    out = conv(fused, w_post)
    return jnp.transpose(out, (0, 3, 1, 2))


# ---------------------------------------------------------------------------
if __name__ == "__main__":
    key = jax.random.PRNGKey(0)
    k1, k2, k3, k4 = jax.random.split(key, 4)

    # Small shapes: in_channels = decode_channels = 4, H = W = 8 (res at 16x16).
    B, Cin, Cd, H, W = 2, 4, 4, 8, 8
    x = jax.random.normal(k1, (B, Cd, H, W), dtype=jnp.float32)            # low-res input
    res = jax.random.normal(k2, (B, Cin, 2 * H, 2 * W), dtype=jnp.float32)  # skip input

    # Deterministic parameter init (OREPA collapsed to single 3x3 convs, HWIO).
    w_pre = 0.1 * jax.random.normal(k3, (3, 3, Cin, Cd), dtype=jnp.float32)
    w_post = 0.1 * jax.random.normal(k4, (3, 3, Cd, Cd), dtype=jnp.float32)
    fuse_raw = jnp.ones((2,), dtype=jnp.float32)   # matches torch.ones(2) init

    # row_tile=8 -> 2 row tiles per image, exercising the tiled/halo path.
    out = wf_forward(x, res, w_pre, w_post, fuse_raw, eps=1e-8, row_tile=8)
    out = jax.block_until_ready(out)

    ref = wf_reference(x, res, w_pre, w_post, fuse_raw, eps=1e-8)
    assert out.shape == (B, Cd, 2 * H, 2 * W), out.shape
    err = float(jnp.max(jnp.abs(out - ref)))
    assert jnp.allclose(out, ref, rtol=2e-3, atol=2e-3), err

    print("KERNEL_OK")
</pallas_src>

<mosaic_0001>
module attributes {stable_mosaic.version = 11 : i64} {
  func.func @kernel(%arg0: i32, %arg1: i32, %arg2: memref<2xf32, #tpu.memory_space<smem>>, %arg3: memref<1x16x16x4xf32, #tpu.memory_space<vmem>>, %arg4: memref<1x10x16x4xf32, #tpu.memory_space<vmem>>, %arg5: memref<36x4xf32, #tpu.memory_space<vmem>>, %arg6: memref<36x4xf32, #tpu.memory_space<vmem>>, %arg7: memref<1x8x16x4xf32, #tpu.memory_space<vmem>>, %arg8: memref<20x16x4xf32, #tpu.memory_space<vmem>>) attributes {dimension_semantics = [#tpu.dimension_semantics<parallel>, #tpu.dimension_semantics<arbitrary>], iteration_bounds = array<i64: 2, 2>, scalar_prefetch = 0 : i64, scratch_operands = 1 : i64, tpu.core_type = #tpu.core_type<tc>, window_params = [{transform_indices = @transform_0, window_bounds = array<i64: 2>}, {transform_indices = @transform_1, window_bounds = array<i64: 1, 16, 16, 4>}, {transform_indices = @transform_2, window_bounds = array<i64: 1, 10, 16, 4>}, {pipeline_mode = #tpu.pipeline_mode<synchronous>, transform_indices = @transform_3, window_bounds = array<i64: 36, 4>}, {pipeline_mode = #tpu.pipeline_mode<synchronous>, transform_indices = @transform_4, window_bounds = array<i64: 36, 4>}, {transform_indices = @transform_5, window_bounds = array<i64: 1, 8, 16, 4>}]} {
    %c0_i32 = arith.constant 0 : i32
    %0 = arith.cmpi eq, %arg1, %c0_i32 : i32
    %1 = arith.extui %0 : i1 to i32
    %c0_i32_0 = arith.constant 0 : i32
    %2 = arith.cmpi ne, %1, %c0_i32_0 : i32
    scf.if %2 {
      %cst_30 = arith.constant 0.000000e+00 : f32
      %107 = vector.broadcast %cst_30 : f32 to vector<20x16x4xf32>
      %c0_31 = arith.constant 0 : index
      %c0_32 = arith.constant 0 : index
      %c0_33 = arith.constant 0 : index
      %108 = vector.load %arg8[%c0_31, %c0_32, %c0_33] : memref<20x16x4xf32, #tpu.memory_space<vmem>>, vector<20x16x4xf32>
      tpu.vector_store %arg8[%c0_31, %c0_32, %c0_33], %107 {strides = array<i32>} : memref<20x16x4xf32, #tpu.memory_space<vmem>>, vector<20x16x4xf32>,
      %c0_34 = arith.constant 0 : index
      %c0_35 = arith.constant 0 : index
      %c0_36 = arith.constant 0 : index
      %c0_37 = arith.constant 0 : index
      %109 = vector.load %arg3[%c0_34, %c0_35, %c0_36, %c0_37] : memref<1x16x16x4xf32, #tpu.memory_space<vmem>>, vector<1x16x16x4xf32>
      %110 = vector.shape_cast %109 : vector<1x16x16x4xf32> to vector<16x16x4xf32>
      %c2 = arith.constant 2 : index
      %c0_38 = arith.constant 0 : index
      %c0_39 = arith.constant 0 : index
      %111 = vector.load %arg8[%c2, %c0_38, %c0_39] : memref<20x16x4xf32, #tpu.memory_space<vmem>>, vector<16x16x4xf32>
      tpu.vector_store %arg8[%c2, %c0_38, %c0_39], %110 {strides = array<i32>} : memref<20x16x4xf32, #tpu.memory_space<vmem>>, vector<16x16x4xf32>,
    } else {
    }
    %c0 = arith.constant 0 : index
    %3 = memref.load %arg2[%c0] : memref<2xf32, #tpu.memory_space<smem>>
    %cst = arith.constant 0.000000e+00 : f32
    %4 = arith.maximumf %3, %cst : f32
    %c1 = arith.constant 1 : index
    %5 = memref.load %arg2[%c1] : memref<2xf32, #tpu.memory_space<smem>>
    %cst_1 = arith.constant 0.000000e+00 : f32
    %6 = arith.maximumf %5, %cst_1 : f32
    %7 = arith.addf %4, %6 : f32
    %cst_2 = arith.constant 9.99999993E-9 : f32
    %8 = arith.addf %7, %cst_2 : f32
    %cst_3 = arith.constant 1.000000e+00 : f32
    %9 = arith.divf %cst_3, %8 : f32
    %10 = arith.mulf %4, %9 : f32
    %11 = arith.mulf %6, %9 : f32
    %c8_i32 = arith.constant 8 : i32
    %12 = arith.muli %arg1, %c8_i32 : i32
    %13 = tpu.assume_multiple %12, 8 : i32
    %c4_i32 = arith.constant 4 : i32
    %14 = arith.muli %arg1, %c4_i32 : i32
    %c0_4 = arith.constant 0 : index
    %15 = arith.index_cast %14 : i32 to index
    %c0_5 = arith.constant 0 : index
    %c0_6 = arith.constant 0 : index
    %16 = vector.load %arg4[%c0_4, %15, %c0_5, %c0_6] : memref<1x10x16x4xf32, #tpu.memory_space<vmem>>, vector<1x5x16x4xf32>
    %17 = vector.shape_cast %16 : vector<1x5x16x4xf32> to vector<5x16x4xf32>
    %c1_i32 = arith.constant 1 : i32
    %18 = arith.addi %14, %c1_i32 : i32
    %c0_7 = arith.constant 0 : index
    %19 = arith.index_cast %18 : i32 to index
    %c0_8 = arith.constant 0 : index
    %c0_9 = arith.constant 0 : index
    %20 = vector.load %arg4[%c0_7, %19, %c0_8, %c0_9] : memref<1x10x16x4xf32, #tpu.memory_space<vmem>>, vector<1x5x16x4xf32>
    %21 = vector.shape_cast %20 : vector<1x5x16x4xf32> to vector<5x16x4xf32>
    %cst_10 = arith.constant 7.500000e-01 : f32
    %22 = vector.broadcast %cst_10 : f32 to vector<5x16x4xf32>
    %23 = arith.mulf %22, %17 : vector<5x16x4xf32>
    %cst_11 = arith.constant 2.500000e-01 : f32
    %24 = vector.broadcast %cst_11 : f32 to vector<5x16x4xf32>
    %25 = arith.mulf %24, %21 : vector<5x16x4xf32>
    %26 = arith.addf %23, %25 : vector<5x16x4xf32>
    %cst_12 = arith.constant 2.500000e-01 : f32
    %27 = vector.broadcast %cst_12 : f32 to vector<5x16x4xf32>
    %28 = arith.mulf %27, %17 : vector<5x16x4xf32>
    %cst_13 = arith.constant 7.500000e-01 : f32
    %29 = vector.broadcast %cst_13 : f32 to vector<5x16x4xf32>
    %30 = arith.mulf %29, %21 : vector<5x16x4xf32>
    %31 = arith.addf %28, %30 : vector<5x16x4xf32>
    %32 = vector.shape_cast %26 : vector<5x16x4xf32> to vector<5x1x16x4xf32>
    %33 = vector.shape_cast %31 : vector<5x16x4xf32> to vector<5x1x16x4xf32>
    %34 = tpu.concatenate %32, %33 in 1 : vector<5x1x16x4xf32>, vector<5x1x16x4xf32> -> vector<5x2x16x4xf32>
    %35 = vector.shape_cast %34 : vector<5x2x16x4xf32> to vector<10x16x4xf32>
    %36 = arith.index_cast %13 : i32 to index
    %c0_14 = arith.constant 0 : index
    %c0_15 = arith.constant 0 : index
    %37 = vector.load %arg8[%36, %c0_14, %c0_15] : memref<20x16x4xf32, #tpu.memory_space<vmem>>, vector<12x16x4xf32>
    %cst_16 = arith.constant 0.000000e+00 : f32
    %38 = vector.broadcast %cst_16 : f32 to vector<12x1x4xf32>
    %39 = tpu.concatenate %38, %37, %38 in 1 : vector<12x1x4xf32>, vector<12x16x4xf32>, vector<12x1x4xf32> -> vector<12x18x4xf32>
    %40 = vector.extract_strided_slice %39 {offsets = [0, 0, 0], sizes = [10, 16, 4], strides = [1, 1, 1]} : vector<12x18x4xf32> to vector<10x16x4xf32>
    %41 = vector.shape_cast %40 : vector<10x16x4xf32> to vector<160x4xf32>
    %42 = vector.extract_strided_slice %39 {offsets = [0, 1, 0], sizes = [10, 16, 4], strides = [1, 1, 1]} : vector<12x18x4xf32> to vector<10x16x4xf32>
    %43 = vector.shape_cast %42 : vector<10x16x4xf32> to vector<160x4xf32>
    %44 = vector.extract_strided_slice %39 {offsets = [0, 2, 0], sizes = [10, 16, 4], strides = [1, 1, 1]} : vector<12x18x4xf32> to vector<10x16x4xf32>
    %45 = vector.shape_cast %44 : vector<10x16x4xf32> to vector<160x4xf32>
    %46 = vector.extract_strided_slice %39 {offsets = [1, 0, 0], sizes = [10, 16, 4], strides = [1, 1, 1]} : vector<12x18x4xf32> to vector<10x16x4xf32>
    %47 = vector.shape_cast %46 : vector<10x16x4xf32> to vector<160x4xf32>
    %48 = vector.extract_strided_slice %39 {offsets = [1, 1, 0], sizes = [10, 16, 4], strides = [1, 1, 1]} : vector<12x18x4xf32> to vector<10x16x4xf32>
    %49 = vector.shape_cast %48 : vector<10x16x4xf32> to vector<160x4xf32>
    %50 = vector.extract_strided_slice %39 {offsets = [1, 2, 0], sizes = [10, 16, 4], strides = [1, 1, 1]} : vector<12x18x4xf32> to vector<10x16x4xf32>
    %51 = vector.shape_cast %50 : vector<10x16x4xf32> to vector<160x4xf32>
    %52 = vector.extract_strided_slice %39 {offsets = [2, 0, 0], sizes = [10, 16, 4], strides = [1, 1, 1]} : vector<12x18x4xf32> to vector<10x16x4xf32>
    %53 = vector.shape_cast %52 : vector<10x16x4xf32> to vector<160x4xf32>
    %54 = vector.extract_strided_slice %39 {offsets = [2, 1, 0], sizes = [10, 16, 4], strides = [1, 1, 1]} : vector<12x18x4xf32> to vector<10x16x4xf32>
    %55 = vector.shape_cast %54 : vector<10x16x4xf32> to vector<160x4xf32>
    %56 = vector.extract_strided_slice %39 {offsets = [2, 2, 0], sizes = [10, 16, 4], strides = [1, 1, 1]} : vector<12x18x4xf32> to vector<10x16x4xf32>
    %57 = vector.shape_cast %56 : vector<10x16x4xf32> to vector<160x4xf32>
    %58 = tpu.concatenate %41, %43, %45, %47, %49, %51, %53, %55, %57 in 1 : vector<160x4xf32>, vector<160x4xf32>, vector<160x4xf32>, vector<160x4xf32>, vector<160x4xf32>, vector<160x4xf32>, vector<160x4xf32>, vector<160x4xf32>, vector<160x4xf32> -> vector<160x36xf32>
    %c0_17 = arith.constant 0 : index
    %c0_18 = arith.constant 0 : index
    %59 = vector.load %arg5[%c0_17, %c0_18] : memref<36x4xf32, #tpu.memory_space<vmem>>, vector<36x4xf32>
    %cst_19 = arith.constant dense<0.000000e+00> : vector<160x4xf32>
    %60 = tpu.matmul %58, %59, %cst_19 {dimension_numbers = #tpu.dot_dimension_numbers<[1], [0], [0], [1], [0, 0, 1, 1], [], []>} : vector<160x36xf32>, vector<36x4xf32>, vector<160x4xf32> -> vector<160x4xf32>
    %61 = vector.shape_cast %60 : vector<160x4xf32> to vector<10x16x4xf32>
    %c1_i32_20 = arith.constant 1 : i32
    %62 = arith.subi %13, %c1_i32_20 : i32
    %63 = tpu.iota {dimensions = array<i32: 0>} : vector<10x1x1xi32>
    %64 = vector.broadcast %62 : i32 to vector<10x1x1xi32>
    %65 = arith.addi %64, %63 : vector<10x1x1xi32>
    %c0_i32_21 = arith.constant 0 : i32
    %66 = vector.broadcast %c0_i32_21 : i32 to vector<10x1x1xi32>
    %67 = arith.cmpi sge, %65, %66 : vector<10x1x1xi32>
    %c16_i32 = arith.constant 16 : i32
    %68 = vector.broadcast %c16_i32 : i32 to vector<10x1x1xi32>
    %69 = arith.cmpi slt, %65, %68 : vector<10x1x1xi32>
    %70 = arith.andi %67, %69 : vector<10x1x1xi1>
    %71 = arith.extui %70 : vector<10x1x1xi1> to vector<10x1x1xi32>
    %72 = arith.sitofp %71 : vector<10x1x1xi32> to vector<10x1x1xf32>
    %73 = vector.broadcast %10 : f32 to vector<10x16x4xf32>
    %74 = arith.mulf %73, %61 : vector<10x16x4xf32>
    %75 = vector.broadcast %11 : f32 to vector<10x16x4xf32>
    %76 = arith.mulf %75, %35 : vector<10x16x4xf32>
    %77 = arith.addf %74, %76 : vector<10x16x4xf32>
    %78 = vector.broadcast %72 : vector<10x1x1xf32> to vector<10x16x4xf32>
    %79 = arith.mulf %78, %77 : vector<10x16x4xf32>
    %cst_22 = arith.constant 0.000000e+00 : f32
    %80 = vector.broadcast %cst_22 : f32 to vector<10x1x4xf32>
    %81 = tpu.concatenate %80, %79, %80 in 1 : vector<10x1x4xf32>, vector<10x16x4xf32>, vector<10x1x4xf32> -> vector<10x18x4xf32>
    %82 = vector.extract_strided_slice %81 {offsets = [0, 0, 0], sizes = [8, 16, 4], strides = [1, 1, 1]} : vector<10x18x4xf32> to vector<8x16x4xf32>
    %83 = vector.shape_cast %82 : vector<8x16x4xf32> to vector<128x4xf32>
    %84 = vector.extract_strided_slice %81 {offsets = [0, 1, 0], sizes = [8, 16, 4], strides = [1, 1, 1]} : vector<10x18x4xf32> to vector<8x16x4xf32>
    %85 = vector.shape_cast %84 : vector<8x16x4xf32> to vector<128x4xf32>
    %86 = vector.extract_strided_slice %81 {offsets = [0, 2, 0], sizes = [8, 16, 4], strides = [1, 1, 1]} : vector<10x18x4xf32> to vector<8x16x4xf32>
    %87 = vector.shape_cast %86 : vector<8x16x4xf32> to vector<128x4xf32>
    %88 = vector.extract_strided_slice %81 {offsets = [1, 0, 0], sizes = [8, 16, 4], strides = [1, 1, 1]} : vector<10x18x4xf32> to vector<8x16x4xf32>
    %89 = vector.shape_cast %88 : vector<8x16x4xf32> to vector<128x4xf32>
    %90 = vector.extract_strided_slice %81 {offsets = [1, 1, 0], sizes = [8, 16, 4], strides = [1, 1, 1]} : vector<10x18x4xf32> to vector<8x16x4xf32>
    %91 = vector.shape_cast %90 : vector<8x16x4xf32> to vector<128x4xf32>
    %92 = vector.extract_strided_slice %81 {offsets = [1, 2, 0], sizes = [8, 16, 4], strides = [1, 1, 1]} : vector<10x18x4xf32> to vector<8x16x4xf32>
    %93 = vector.shape_cast %92 : vector<8x16x4xf32> to vector<128x4xf32>
    %94 = vector.extract_strided_slice %81 {offsets = [2, 0, 0], sizes = [8, 16, 4], strides = [1, 1, 1]} : vector<10x18x4xf32> to vector<8x16x4xf32>
    %95 = vector.shape_cast %94 : vector<8x16x4xf32> to vector<128x4xf32>
    %96 = vector.extract_strided_slice %81 {offsets = [2, 1, 0], sizes = [8, 16, 4], strides = [1, 1, 1]} : vector<10x18x4xf32> to vector<8x16x4xf32>
    %97 = vector.shape_cast %96 : vector<8x16x4xf32> to vector<128x4xf32>
    %98 = vector.extract_strided_slice %81 {offsets = [2, 2, 0], sizes = [8, 16, 4], strides = [1, 1, 1]} : vector<10x18x4xf32> to vector<8x16x4xf32>
    %99 = vector.shape_cast %98 : vector<8x16x4xf32> to vector<128x4xf32>
    %100 = tpu.concatenate %83, %85, %87, %89, %91, %93, %95, %97, %99 in 1 : vector<128x4xf32>, vector<128x4xf32>, vector<128x4xf32>, vector<128x4xf32>, vector<128x4xf32>, vector<128x4xf32>, vector<128x4xf32>, vector<128x4xf32>, vector<128x4xf32> -> vector<128x36xf32>
    %c0_23 = arith.constant 0 : index
    %c0_24 = arith.constant 0 : index
    %101 = vector.load %arg6[%c0_23, %c0_24] : memref<36x4xf32, #tpu.memory_space<vmem>>, vector<36x4xf32>
    %cst_25 = arith.constant dense<0.000000e+00> : vector<128x4xf32>
    %102 = tpu.matmul %100, %101, %cst_25 {dimension_numbers = #tpu.dot_dimension_numbers<[1], [0], [0], [1], [0, 0, 1, 1], [], []>} : vector<128x36xf32>, vector<36x4xf32>, vector<128x4xf32> -> vector<128x4xf32>
    %103 = vector.shape_cast %102 : vector<128x4xf32> to vector<8x16x4xf32>
    %c0_26 = arith.constant 0 : index
    %c0_27 = arith.constant 0 : index
    %c0_28 = arith.constant 0 : index
    %c0_29 = arith.constant 0 : index
    %104 = vector.load %arg7[%c0_26, %c0_27, %c0_28, %c0_29] : memref<1x8x16x4xf32, #tpu.memory_space<vmem>>, vector<1x8x16x4xf32>
    %105 = vector.shape_cast %104 : vector<1x8x16x4xf32> to vector<8x16x4xf32>
    %106 = vector.shape_cast %103 : vector<8x16x4xf32> to vector<1x8x16x4xf32>
    tpu.vector_store %arg7[%c0_26, %c0_27, %c0_28, %c0_29], %106 {strides = array<i32>} : memref<1x8x16x4xf32, #tpu.memory_space<vmem>>, vector<1x8x16x4xf32>,
    return
  }
  func.func @transform_0(%arg0: i32, %arg1: i32) -> i32 {
    %c0_i32 = arith.constant 0 : i32
    %c0_i32_0 = arith.constant 0 : i32
    return %c0_i32 : i32
  }
  func.func @transform_1(%arg0: i32, %arg1: i32) -> (i32, i32, i32, i32) {
    %c0_i32 = arith.constant 0 : i32
    %c0_i32_0 = arith.constant 0 : i32
    %c0_i32_1 = arith.constant 0 : i32
    %c0_i32_2 = arith.constant 0 : i32
    return %arg0, %c0_i32, %c0_i32_0, %c0_i32_1 : i32, i32, i32, i32
  }
  func.func @transform_2(%arg0: i32, %arg1: i32) -> (i32, i32, i32, i32) {
    %c0_i32 = arith.constant 0 : i32
    %c0_i32_0 = arith.constant 0 : i32
    %c0_i32_1 = arith.constant 0 : i32
    %c0_i32_2 = arith.constant 0 : i32
    return %arg0, %c0_i32, %c0_i32_0, %c0_i32_1 : i32, i32, i32, i32
  }
  func.func @transform_3(%arg0: i32, %arg1: i32) -> (i32, i32) {
    %c0_i32 = arith.constant 0 : i32
    %c0_i32_0 = arith.constant 0 : i32
    %c0_i32_1 = arith.constant 0 : i32
    return %c0_i32, %c0_i32_0 : i32, i32
  }
  func.func @transform_4(%arg0: i32, %arg1: i32) -> (i32, i32) {
    %c0_i32 = arith.constant 0 : i32
    %c0_i32_0 = arith.constant 0 : i32
    %c0_i32_1 = arith.constant 0 : i32
    return %c0_i32, %c0_i32_0 : i32, i32
  }
  func.func @transform_5(%arg0: i32, %arg1: i32) -> (i32, i32, i32, i32) {
    %c0_i32 = arith.constant 0 : i32
    %c0_i32_0 = arith.constant 0 : i32
    %c0_i32_1 = arith.constant 0 : i32
    return %arg0, %arg1, %c0_i32, %c0_i32_0 : i32, i32, i32, i32
  }
}

</mosaic_0001>

<bundles_post_ra>
// kernel: wf_forward.1
= control target key start
LH: loop header
LB: loop body
LE: loop exit
PB: predicated region body
PF: predicated region fallthrough
CT: control target
= control target key end

     0   :  { %10 = vsyncpa [#allocation4], 0  ;;  %s3253_s18 = smov 0   ;;  %s3255_s19 = smov 0   ;;  %s5108_s0 = inlined_call_operand.vmem [shape: f32[2], index: 0, kind: input, shape index: {}]   ;;  %s5109_s1 = inlined_call_operand.vmem [shape: f32[2,16,16,4], index: 1, kind: input, shape index: {}]   ;;  %s5110_s2 = inlined_call_operand.vmem [shape: f32[2,10,16,4], index: 2, kind: input, shape index: {}]   ;;  %s5111_s3 = inlined_call_operand.vmem [shape: f32[36,4], index: 3, kind: input, shape index: {}]   ;;  %s5112_s4 = inlined_call_operand.vmem [shape: f32[36,4], index: 4, kind: input, shape index: {}]   ;;  %s5113_s5 = inlined_call_operand.vmem [shape: f32[2,16,16,4], index: 5, kind: output, shape index: {}]  }
   0x1   :  { %s3257_s20 = smov 0   ;;  %s3259_s21 = smov 0  }
   0x2   :  { %s3261_s22 = smov 0  }
   0x3 LB: > { %s2878_s23 = sadd.s32 4294967295, %s3209_s22   ;;  %s25_s24 = sadd.s32 1, %s3201_s20  ;;  %s3209_s22 = sphi %s3261_s22, %s16_s22   ;;  %s3205_s21 = sphi %s3259_s21, %s5129_s21   ;;  %s3201_s20 = sphi %s3257_s20, %s5128_s20   ;;  %s3197_s19 = sphi %s3255_s19, %s5127_s19   ;;  %s3193_s18 = sphi %s3253_s18, %s5126_s18  }
   0x4   : > { %p26_p0 = scmp.ge.s32.totalorder %s25_s24, 2  ;;  %s28_s25 = sadd.s32 1, %s3205_s21 }
   0x5   : > { %p2880_p1 = scmp.ge.s32.totalorder %s3209_s22, 1  ;;  %p176_p2 = scmp.lt.s32.totalorder %s3209_s22, 5 }
   0x6   : > { %s5131_s24 = smov (%p26_p0, %s25_s24), 0  ;;  %s5133_s25 = smov (!%p26_p0, %s28_s25), %s3205_s21 }
   0x7   : > { %p3286_p3 = pnand %p2880_p1, %p176_p2  ;;  %p30_p4 = scmp.ge.s32.totalorder %s5133_s25, 2 }
   0x8   : > { %p3290_p5 = scmp.eq.s32.totalorder %s2878_s23, 0  ;;  %s189_s30 = sshll.u32 %s5108_s0, 4  ;;  %s190_s30 = int_to_ptr.vmem [resolvable:$true] %s189_s30 }
   0x9   : > { %p3092_p6 = pneg %p3286_p3  ;;  %s5135_s25 = smov (%p30_p4, %s5133_s25), 0 }
   0xa   : > { %s3152_s6 = scalar_lea.vmem %s190_s30, 16  ;;  %p3160_p12 = scmp.lt.s32.totalorder %s190_s30, %s190_s30 }
   0xb   : > { %p3093_p7 = pnand %p3290_p5, %p3092_p6  ;;  %p3153_p8 = scmp.ne.s32.totalorder %s190_s30, %s3152_s6 }
   0xc   : > { %p3161_p13 = scmp.lt.s32.totalorder %s3152_s6, %s3152_s6 }
   0xd   : > { %p3154_p9 = pneg %p3093_p7 }
   0xe   : > { %p3162_p0 = por %p3161_p13, %p3160_p12 }
   0xf   : > { %p3155_p10 = pnand %p3154_p9, %p3153_p8 }
  0x11   : > { %p3156_p11 = pneg %p3155_p10 }
  0x13   : > { %p3163_p1 = pnand %p3162_p0, %p3156_p11 }
  0x15   : > { %3166 = shalt.err (!%p3163_p1)
}
  0x16   : > { %s3211_s7 = smov [#allocation3]   ;;  %224 = sbr.rel (%p3286_p3) target bundleno = 1065 (0x429), region = 40 }
  0x17   : > { %3095 = dma.vmem_to_smem (!%p3093_p7), %s190_s30, 16, %s3211_s7, [#allocation4]  }
  0x1b   : > { %3188 = dma.done.wait (%p3290_p5), [#allocation4], 16  }
  0x1c   : > { %3190 = vsyncadd (%p3290_p5), [#allocation4], 4294967280 }
  0x1d   : > { %230 = sfence }
  0x1e   : > { %p263_p2 = scmp.lt.s32.totalorder %s3197_s19, 1  ;;  %s3311_s8 = sshll.u32 %s3193_s18, 3 }
  0x1f   : > { %p276_p4 = scmp.lt.s32.totalorder %s3311_s8, 15  ;;  %p2892_p3 = scmp.ne.s32.totalorder %s3193_s18, 0 }
  0x20   : > { %s5137_s19 = smov (!%p263_p2, %s3197_s19), 1 }
  0x21   : > { %s277_s9 = scalar_select %p276_p4, %s3311_s8, 15 }
  0x22   : > { %s2961_s10 = sshll.u32 %s5137_s19, 8  ;;  %s3085_s11 = smul.u32 160, %s5137_s19 }
  0x23   : > { %s3319_s14 = scalar_lea.vmem %s5109_s1, %s2961_s10  ;;  %s2889_s15 = sshll.u32 %s277_s9, 1 }
  0x24   : > { %s3324_s23 = scalar_lea.vmem %s5110_s2, %s3085_s11  ;;  %s2890_s26 = sshll.u32 %s5137_s19, 5 }
  0x25   : > { %s280_s27 = sadd.s32 %s2890_s26, %s2889_s15  ;;  %287 = sbr.rel (%p2892_p3) target bundleno = 79 (0x4f), region = 48 }
  0x26   : > { %s2891_s28 = sshll.u32 %s280_s27, 3 }
  0x27   : > { %s3329_s6 = scalar_lea.vmem %s5113_s5, %s2891_s28 }
  0x2a   : > { %vm288_vm0 = vcmask 31744   ;;  %v329_v0 = vld [vmem:[%s3319_s14] sm:$0xff]  ;;  %v330_v1 = vld [vmem:[%s3319_s14 + $0x8] sm:$0xff]  ;;  %v331_v2 = vld [vmem:[%s3319_s14 + $0x10] sm:$0xff]  ;;  %v3212_v3 = vmov 0.0  }
  0x2b   : > { %293 = vst.msk [vmem:[#allocation2 + $0x20] sm:$0xff] %vm288_vm0, %v3212_v3  ;;  %289 = vst.msk [vmem:[#allocation2] sm:$0xff] %vm288_vm0, %v3212_v3  ;;  %v332_v4 = vld [vmem:[%s3319_s14 + $0x18] sm:$0xff]  ;;  %v333_v5 = vld [vmem:[%s3319_s14 + $0x20] sm:$0xff] }
  0x2c   : > { %290 = vst.msk [vmem:[#allocation2 + $0x8] sm:$0xff] %vm288_vm0, %v3212_v3  ;;  %291 = vst.msk [vmem:[#allocation2 + $0x10] sm:$0xff] %vm288_vm0, %v3212_v3  ;;  %v334_v6 = vld [vmem:[%s3319_s14 + $0x28] sm:$0xff]  ;;  %v335_v7 = vld [vmem:[%s3319_s14 + $0x30] sm:$0xff] }
  0x2d   : > { %292 = vst.msk [vmem:[#allocation2 + $0x18] sm:$0xff] %vm288_vm0, %v3212_v3  ;;  %294 = vst.msk [vmem:[#allocation2 + $0x28] sm:$0xff] %vm288_vm0, %v3212_v3  ;;  %v336_v8 = vld [vmem:[%s3319_s14 + $0x38] sm:$0xff]  ;;  %v337_v9 = vld [vmem:[%s3319_s14 + $0x40] sm:$0xff] }
  0x2e   : > { %295 = vst.msk [vmem:[#allocation2 + $0x30] sm:$0xff] %vm288_vm0, %v3212_v3  ;;  %296 = vst.msk [vmem:[#allocation2 + $0x38] sm:$0xff] %vm288_vm0, %v3212_v3  ;;  %v338_v10 = vld [vmem:[%s3319_s14 + $0x48] sm:$0xff]  ;;  %v339_v11 = vld [vmem:[%s3319_s14 + $0x50] sm:$0xff] }
  0x2f   : > { %297 = vst.msk [vmem:[#allocation2 + $0x40] sm:$0xff] %vm288_vm0, %v3212_v3  ;;  %298 = vst.msk [vmem:[#allocation2 + $0x48] sm:$0xff] %vm288_vm0, %v3212_v3  ;;  %v340_v12 = vld [vmem:[%s3319_s14 + $0x58] sm:$0xff]  ;;  %v341_v13 = vld [vmem:[%s3319_s14 + $0x60] sm:$0xff] }
  0x30   : > { %299 = vst.msk [vmem:[#allocation2 + $0x50] sm:$0xff] %vm288_vm0, %v3212_v3  ;;  %300 = vst.msk [vmem:[#allocation2 + $0x58] sm:$0xff] %vm288_vm0, %v3212_v3  ;;  %v342_v14 = vld [vmem:[%s3319_s14 + $0x68] sm:$0xff]  ;;  %v343_v15 = vld [vmem:[%s3319_s14 + $0x70] sm:$0xff] }
  0x31   : > { %301 = vst.msk [vmem:[#allocation2 + $0x60] sm:$0xff] %vm288_vm0, %v3212_v3  ;;  %302 = vst.msk [vmem:[#allocation2 + $0x68] sm:$0xff] %vm288_vm0, %v3212_v3  ;;  %v344_v16 = vld [vmem:[%s3319_s14 + $0x78] sm:$0xff]  ;;  %v345_v17 = vld [vmem:[%s3319_s14 + $0x80] sm:$0xff] }
  0x32   : > { %303 = vst.msk [vmem:[#allocation2 + $0x70] sm:$0xff] %vm288_vm0, %v3212_v3  ;;  %304 = vst.msk [vmem:[#allocation2 + $0x78] sm:$0xff] %vm288_vm0, %v3212_v3  ;;  %v346_v18 = vld [vmem:[%s3319_s14 + $0x88] sm:$0xff]  ;;  %v347_v19 = vld [vmem:[%s3319_s14 + $0x90] sm:$0xff] }
  0x33   : > { %305 = vst.msk [vmem:[#allocation2 + $0x80] sm:$0xff] %vm288_vm0, %v3212_v3  ;;  %306 = vst.msk [vmem:[#allocation2 + $0x88] sm:$0xff] %vm288_vm0, %v3212_v3  ;;  %v348_v20 = vld [vmem:[%s3319_s14 + $0x98] sm:$0xff]  ;;  %v349_v21 = vld [vmem:[%s3319_s14 + $0xa0] sm:$0xff] }
  0x34   : > { %307 = vst.msk [vmem:[#allocation2 + $0x90] sm:$0xff] %vm288_vm0, %v3212_v3  ;;  %308 = vst.msk [vmem:[#allocation2 + $0x98] sm:$0xff] %vm288_vm0, %v3212_v3  ;;  %v350_v22 = vld [vmem:[%s3319_s14 + $0xa8] sm:$0xff]  ;;  %v351_v23 = vld [vmem:[%s3319_s14 + $0xb0] sm:$0xff] }
  0x35   : > { %309 = vst.msk [vmem:[#allocation2 + $0xa0] sm:$0xff] %vm288_vm0, %v3212_v3  ;;  %310 = vst.msk [vmem:[#allocation2 + $0xa8] sm:$0xff] %vm288_vm0, %v3212_v3  ;;  %v352_v24 = vld [vmem:[%s3319_s14 + $0xb8] sm:$0xff]  ;;  %v353_v25 = vld [vmem:[%s3319_s14 + $0xc0] sm:$0xff] }
  0x36   : > { %311 = vst.msk [vmem:[#allocation2 + $0xb0] sm:$0xff] %vm288_vm0, %v3212_v3  ;;  %312 = vst.msk [vmem:[#allocation2 + $0xb8] sm:$0xff] %vm288_vm0, %v3212_v3  ;;  %v354_v26 = vld [vmem:[%s3319_s14 + $0xc8] sm:$0xff]  ;;  %v355_v27 = vld [vmem:[%s3319_s14 + $0xd0] sm:$0xff] }
  0x37   : > { %313 = vst.msk [vmem:[#allocation2 + $0xc0] sm:$0xff] %vm288_vm0, %v3212_v3  ;;  %314 = vst.msk [vmem:[#allocation2 + $0xc8] sm:$0xff] %vm288_vm0, %v3212_v3  ;;  %v356_v28 = vld [vmem:[%s3319_s14 + $0xd8] sm:$0xff]  ;;  %v357_v29 = vld [vmem:[%s3319_s14 + $0xe0] sm:$0xff] }
  0x38   : > { %315 = vst.msk [vmem:[#allocation2 + $0xd0] sm:$0xff] %vm288_vm0, %v3212_v3  ;;  %316 = vst.msk [vmem:[#allocation2 + $0xd8] sm:$0xff] %vm288_vm0, %v3212_v3  ;;  %v358_v30 = vld [vmem:[%s3319_s14 + $0xe8] sm:$0xff]  ;;  %v359_v31 = vld [vmem:[%s3319_s14 + $0xf0] sm:$0xff] }
  0x39   : > { %317 = vst.msk [vmem:[#allocation2 + $0xe0] sm:$0xff] %vm288_vm0, %v3212_v3  ;;  %318 = vst.msk [vmem:[#allocation2 + $0xe8] sm:$0xff] %vm288_vm0, %v3212_v3  ;;  %v360_v32 = vld [vmem:[%s3319_s14 + $0xf8] sm:$0xff] }
  0x3a   : > { %319 = vst.msk [vmem:[#allocation2 + $0xf0] sm:$0xff] %vm288_vm0, %v3212_v3  ;;  %320 = vst.msk [vmem:[#allocation2 + $0xf8] sm:$0xff] %vm288_vm0, %v3212_v3 }
  0x3b   : > { %321 = vst.msk [vmem:[#allocation2 + $0x100] sm:$0xff] %vm288_vm0, %v3212_v3  ;;  %322 = vst.msk [vmem:[#allocation2 + $0x108] sm:$0xff] %vm288_vm0, %v3212_v3 }
  0x3c   : > { %323 = vst.msk [vmem:[#allocation2 + $0x110] sm:$0xff] %vm288_vm0, %v3212_v3  ;;  %324 = vst.msk [vmem:[#allocation2 + $0x118] sm:$0xff] %vm288_vm0, %v3212_v3 }
  0x3d   : > { %325 = vst.msk [vmem:[#allocation2 + $0x120] sm:$0xff] %vm288_vm0, %v3212_v3  ;;  %326 = vst.msk [vmem:[#allocation2 + $0x128] sm:$0xff] %vm288_vm0, %v3212_v3 }
  0x3e   : > { %327 = vst.msk [vmem:[#allocation2 + $0x130] sm:$0xff] %vm288_vm0, %v3212_v3  ;;  %328 = vst.msk [vmem:[#allocation2 + $0x138] sm:$0xff] %vm288_vm0, %v3212_v3 }
  0x3f   : > { %362 = vst.msk [vmem:[#allocation2 + $0x20] sm:$0xff] %vm288_vm0, %v329_v0  ;;  %363 = vst.msk [vmem:[#allocation2 + $0x28] sm:$0xff] %vm288_vm0, %v330_v1 }
  0x40   : > { %364 = vst.msk [vmem:[#allocation2 + $0x30] sm:$0xff] %vm288_vm0, %v331_v2  ;;  %365 = vst.msk [vmem:[#allocation2 + $0x38] sm:$0xff] %vm288_vm0, %v332_v4 }
  0x41   : > { %366 = vst.msk [vmem:[#allocation2 + $0x40] sm:$0xff] %vm288_vm0, %v333_v5  ;;  %367 = vst.msk [vmem:[#allocation2 + $0x48] sm:$0xff] %vm288_vm0, %v334_v6 }
  0x42   : > { %368 = vst.msk [vmem:[#allocation2 + $0x50] sm:$0xff] %vm288_vm0, %v335_v7  ;;  %369 = vst.msk [vmem:[#allocation2 + $0x58] sm:$0xff] %vm288_vm0, %v336_v8 }
  0x43   : > { %370 = vst.msk [vmem:[#allocation2 + $0x60] sm:$0xff] %vm288_vm0, %v337_v9  ;;  %371 = vst.msk [vmem:[#allocation2 + $0x68] sm:$0xff] %vm288_vm0, %v338_v10 }
  0x44   : > { %372 = vst.msk [vmem:[#allocation2 + $0x70] sm:$0xff] %vm288_vm0, %v339_v11  ;;  %373 = vst.msk [vmem:[#allocation2 + $0x78] sm:$0xff] %vm288_vm0, %v340_v12 }
  0x45   : > { %374 = vst.msk [vmem:[#allocation2 + $0x80] sm:$0xff] %vm288_vm0, %v341_v13  ;;  %375 = vst.msk [vmem:[#allocation2 + $0x88] sm:$0xff] %vm288_vm0, %v342_v14 }
  0x46   : > { %376 = vst.msk [vmem:[#allocation2 + $0x90] sm:$0xff] %vm288_vm0, %v343_v15  ;;  %377 = vst.msk [vmem:[#allocation2 + $0x98] sm:$0xff] %vm288_vm0, %v344_v16 }
  0x47   : > { %378 = vst.msk [vmem:[#allocation2 + $0xa0] sm:$0xff] %vm288_vm0, %v345_v17  ;;  %379 = vst.msk [vmem:[#allocation2 + $0xa8] sm:$0xff] %vm288_vm0, %v346_v18 }
  0x48   : > { %380 = vst.msk [vmem:[#allocation2 + $0xb0] sm:$0xff] %vm288_vm0, %v347_v19  ;;  %381 = vst.msk [vmem:[#allocation2 + $0xb8] sm:$0xff] %vm288_vm0, %v348_v20 }
  0x49   : > { %382 = vst.msk [vmem:[#allocation2 + $0xc0] sm:$0xff] %vm288_vm0, %v349_v21  ;;  %383 = vst.msk [vmem:[#allocation2 + $0xc8] sm:$0xff] %vm288_vm0, %v350_v22 }
  0x4a   : > { %384 = vst.msk [vmem:[#allocation2 + $0xd0] sm:$0xff] %vm288_vm0, %v351_v23  ;;  %385 = vst.msk [vmem:[#allocation2 + $0xd8] sm:$0xff] %vm288_vm0, %v352_v24 }
  0x4b   : > { %386 = vst.msk [vmem:[#allocation2 + $0xe0] sm:$0xff] %vm288_vm0, %v353_v25  ;;  %387 = vst.msk [vmem:[#allocation2 + $0xe8] sm:$0xff] %vm288_vm0, %v354_v26 }
  0x4c   : > { %388 = vst.msk [vmem:[#allocation2 + $0xf0] sm:$0xff] %vm288_vm0, %v355_v27  ;;  %389 = vst.msk [vmem:[#allocation2 + $0xf8] sm:$0xff] %vm288_vm0, %v356_v28 }
  0x4d   : > { %390 = vst.msk [vmem:[#allocation2 + $0x100] sm:$0xff] %vm288_vm0, %v357_v29  ;;  %391 = vst.msk [vmem:[#allocation2 + $0x108] sm:$0xff] %vm288_vm0, %v358_v30 }
  0x4e   : > { %392 = vst.msk [vmem:[#allocation2 + $0x110] sm:$0xff] %vm288_vm0, %v359_v31  ;;  %393 = vst.msk [vmem:[#allocation2 + $0x118] sm:$0xff] %vm288_vm0, %v360_v32 }
  0x4f PF: > { %s2964_s19 = sshll.u32 %s3193_s18, 7  ;;  %vm542_vm1 = vcmask 1040384   ;;  %vm657_vm2 = vcmask 1046528   ;;  %s3213_s9 = smov 4   ;;  %vm708_vm3 = vcmask 1045504   ;;  %vm1497_vm4 = vcmask 1043456  }
  0x50   : > { %s3437_s7 = scalar_lea.vmem [#allocation2], %s2964_s19  ;;  %s3214_s10 = smov 8   ;;  %v1435_v15 = vld [vmem:[%s5111_s3 + $0x20] sm:$0xf]  ;;  %v1434_v16 = vld [vmem:[%s5111_s3 + $0x18] sm:$0xff]  ;;  %v1433_v17 = vld [vmem:[%s5111_s3 + $0x10] sm:$0xff] }
  0x51   : > { %s3215_s11 = smov 12   ;;  %s3216_s12 = smov 16   ;;  %3011 = vmatprep.subr.msk.mxu0 %vm1497_vm4, %v1435_v15  ;;  %v1432_v18 = vld [vmem:[%s5111_s3 + $0x8] sm:$0xff]  ;;  %v1431_v21 = vld [vmem:[%s5111_s3] sm:$0xff]  ;;  %vm1263_vm5 = vcmask 31744   ;;  %vm1284_vm6 = vcmask 64512  }
  0x52   : > { %s3217_s13 = smov 20   ;;  %s3218_s14 = smov 24   ;;  %3012 = vmatpush3.msk.msra.mxu0 %vm1497_vm4, %v1435_v15  ;;  %vm1305_vm7 = vcmask 97280   ;;  %vm1326_vm8 = vcmask 130048   ;;  %vm1347_vm9 = vcmask 162816   ;;  %vm1368_vm10 = vcmask 195584  }
  0x53   : > { %3013 = vmatprep.subr.mxu0 %v1434_v16  ;;  %s3219_s29 = smov 28   ;;  %s3220_s17 = smov 32   ;;  %vm1389_vm11 = vcmask 228352   ;;  %vm1410_vm12 = vcmask 261120   ;;  %vm1436_vm13 = vcmask 293888  }
  0x54   : > { %3014 = vmatpush3.msra.mxu0 %v1434_v16  ;;  %s394_s26 = sld [smem:[#allocation3]]  ;;  %s3221_s28 = smov 0.0  }
  0x55   : > { %v496_v33 = vld [vmem:[%s3437_s7 + $0x10] sm:$0xff]  ;;  %v497_v34 = vld [vmem:[%s3437_s7 + $0x18] sm:$0xff]  ;;  %v494_v35 = vld [vmem:[%s3437_s7] sm:$0xff]  ;;  %3015 = vmatprep.subr.mxu0 %v1433_v17  ;;  %s2893_s27 = sld [smem:[#allocation3 + $0x1]] }
  0x56   : > { %v546_v36 = vrot.slane %v496_v33, 7  ;;  %v547_v37 = vrot.slane %v497_v34, 7  ;;  %v495_v38 = vld [vmem:[%s3437_s7 + $0x8] sm:$0xff]  ;;  %v543_v39 = vrot.slane %v494_v35, 7  ;;  %v498_v40 = vld [vmem:[%s3437_s7 + $0x20] sm:$0xff]  ;;  %3016 = vmatpush3.msra.mxu0 %v1433_v17  ;;  %v500_v24 = vld [vmem:[%s3437_s7 + $0x30] sm:$0xff] }
  0x57   : > { %v499_v41 = vld [vmem:[%s3437_s7 + $0x28] sm:$0xff]  ;;  %v544_v42 = vrot.slane %v495_v38, 7  ;;  %v549_v43 = vrot.slane %v498_v40, 7  ;;  %3017 = vmatprep.subr.mxu0 %v1432_v18  ;;  %v501_v25 = vld [vmem:[%s3437_s7 + $0x38] sm:$0xff]  ;;  %v552_v26 = vrot.slane %v500_v24, 7 }
  0x58   : > { %v550_v44 = vrot.slane %v499_v41, 7  ;;  %v3446_v45 = vsel %vm542_vm1, %v546_v36, %v547_v37  ;;  %v3449_v46 = vsel %vm542_vm1, 0.0, %v546_v36  ;;  %v3452_v47 = vsel %vm542_vm1, 0.0, %v543_v39  ;;  %3018 = vmatpush3.msra.mxu0 %v1432_v18 }
  0x59   : > { %v626_v48 = vsel %vm542_vm1, %v547_v37, 0.0  ;;  %v663_v49 = vrot.slane %v3449_v46, 1  ;;  %v664_v50 = vrot.slane %v3446_v45, 1  ;;  %v3458_v51 = vsel %vm542_vm1, %v543_v39, %v544_v42  ;;  %3019 = vmatprep.subr.mxu0 %v1431_v21 }
  0x5a   : > { %v658_v52 = vrot.slane %v3452_v47, 1  ;;  %v659_v53 = vrot.slane %v3458_v51, 1  ;;  %v666_v54 = vrot.slane %v626_v48, 1  ;;  %v625_v55 = vsel %vm542_vm1, %v544_v42, 0.0  ;;  %3020 = vmatpush3.msra.mxu0 %v1431_v21  ;;  %v502_v42 = vld [vmem:[%s3437_s7 + $0x40] sm:$0xff]  ;;  %s3720_s30 = smax.f32 %s3221_s28, %s394_s26  ;;  %s2962_s26 = sshll.u32 %s3193_s18, 6 }
  0x5b   : > { %v3464_v56 = vsel %vm542_vm1, %v549_v43, %v550_v44  ;;  %v665_v57 = vsel %vm657_vm2, %v663_v49, %v664_v50  ;;  %v661_v58 = vrot.slane %v625_v55, 1  ;;  %v3468_v59 = vsel %vm542_vm1, %v550_v44, 0.0  ;;  %s3724_s19 = smax.f32 %s3221_s28, %s2893_s27  ;;  %s3984_s27 = scalar_lea.vmem %s3324_s23, %s2962_s26 }
  0x5c   : > { %787 = vrot.lane.b32.xlu1 %v665_v57, %s3213_s9  ;;  %v660_v60 = vsel %vm657_vm2, %v658_v52, %v659_v53  ;;  %v3473_v61 = vsel %vm542_vm1, 0.0, %v549_v43  ;;  %v667_v62 = vsel %vm657_vm2, %v664_v50, %v666_v54  ;;  %v669_v63 = vrot.slane %v3464_v56, 1  ;;  %v503_v43 = vld [vmem:[%s3437_s7 + $0x48] sm:$0xff]  ;;  %s398_s15 = sadd.f32 %s3724_s19, %s3720_s30 }
  0x5d   : > { %783 = vrot.lane.b32.xlu0 %v660_v60, %s3213_s9  ;;  %v671_v0 = vrot.slane %v3468_v59, 1  ;;  %v662_v1 = vsel %vm657_vm2, %v659_v53, %v661_v58  ;;  %v668_v2 = vrot.slane %v3473_v61, 1  ;;  %v710_v4 = vrot.slane %v3458_v51, 2 }
  0x5e   : > { %v712_v5 = vrot.slane %v625_v55, 2  ;;  %v709_v7 = vrot.slane %v3452_v47, 2  ;;  %v714_v10 = vrot.slane %v3449_v46, 2  ;;  %v715_v11 = vrot.slane %v3446_v45, 2  ;;  %s399_s16 = sadd.f32 1e-08, %s398_s15 }
  0x5f   : > { %v672_v3 = vsel %vm657_vm2, %v669_v63, %v671_v0  ;;  %v670_v6 = vsel %vm657_vm2, %v668_v2, %v669_v63  ;;  %v717_v13 = vrot.slane %v626_v48, 2  ;;  %v719_v19 = vrot.slane %v3473_v61, 2  ;;  %v505_v2 = vld [vmem:[%s3437_s7 + $0x58] sm:$0xff] }
  0x60   : > { %789 = vrot.lane.b32.xlu1 %v667_v62, %s3213_s9  ;;  %v713_v8 = vsel %vm708_vm3, %v710_v4, %v712_v5  ;;  %v711_v9 = vsel %vm708_vm3, %v709_v7, %v710_v4  ;;  %v716_v12 = vsel %vm708_vm3, %v714_v10, %v715_v11  ;;  %v720_v20 = vrot.slane %v3464_v56, 2 }
  0x61   : > { %785 = vrot.lane.b32.xlu0 %v662_v1, %s3213_s9  ;;  %v718_v14 = vsel %vm708_vm3, %v715_v11, %v717_v13  ;;  %v722_v23 = vrot.slane %v3468_v59, 2  ;;  %v553_v28 = vrot.slane %v501_v25, 7  ;;  %v3548_v29 = vsel %vm542_vm1, 0.0, %v552_v26  ;;  %v504_v1 = vld [vmem:[%s3437_s7 + $0x50] sm:$0xff] }
  0x62   : > { %v721_v22 = vsel %vm708_vm3, %v719_v19, %v720_v20  ;;  %v673_v31 = vrot.slane %v3548_v29, 1  ;;  %v724_v35 = vrot.slane %v3548_v29, 2  ;;  %v555_v44 = vrot.slane %v502_v42, 7 }
  0x63   : > { %v723_v27 = vsel %vm708_vm3, %v720_v20, %v722_v23  ;;  %v3551_v30 = vsel %vm542_vm1, %v552_v26, %v553_v28  ;;  %v628_v34 = vsel %vm542_vm1, %v553_v28, 0.0  ;;  %v556_v48 = vrot.slane %v503_v43, 7 }
  0x64   : > { %793 = vrot.lane.b32.xlu1 %v672_v3, %s3213_s9  ;;  %v674_v32 = vrot.slane %v3551_v30, 1  ;;  %v725_v36 = vrot.slane %v3551_v30, 2  ;;  %v676_v37 = vrot.slane %v628_v34, 1  ;;  %v727_v40 = vrot.slane %v628_v34, 2 }
  0x65   : > { %791 = vrot.lane.b32.xlu0 %v670_v6, %s3213_s9  ;;  %v3585_v49 = vsel %vm542_vm1, 0.0, %v555_v44  ;;  %v3588_v50 = vsel %vm542_vm1, %v555_v44, %v556_v48  ;;  %v629_v55 = vsel %vm542_vm1, %v556_v48, 0.0  ;;  %v559_v5 = vrot.slane %v505_v2, 7 }
  0x66   : > { %v675_v33 = vsel %vm657_vm2, %v673_v31, %v674_v32  ;;  %v726_v38 = vsel %vm708_vm3, %v724_v35, %v725_v36  ;;  %v677_v39 = vsel %vm657_vm2, %v674_v32, %v676_v37  ;;  %v728_v41 = vsel %vm708_vm3, %v725_v36, %v727_v40  ;;  %v506_v35 = vld [vmem:[%s3437_s7 + $0x60] sm:$0xff]  ;;  %v507_v37 = vld [vmem:[%s3437_s7 + $0x68] sm:$0xff] }
  0x67   : > { %v678_v52 = vrot.slane %v3585_v49, 1  ;;  %v679_v53 = vrot.slane %v3588_v50, 1  ;;  %v730_v58 = vrot.slane %v3588_v50, 2  ;;  %v681_v59 = vrot.slane %v629_v55, 1 }
  0x68   : > { %845 = vrot.lane.b32.xlu1 %v713_v8, %s3214_s10  ;;  %v732_v63 = vrot.slane %v629_v55, 2  ;;  %v630_v18 = vsel %vm542_vm1, %v559_v5, 0.0  ;;  %v562_v40 = vrot.slane %v507_v37, 7 }
  0x69   : > { %843 = vrot.lane.b32.xlu0 %v711_v9, %s3214_s10  ;;  %v680_v54 = vsel %vm657_vm2, %v678_v52, %v679_v53  ;;  %v737_v28 = vrot.slane %v630_v18, 2 }
  0x6a   : > { %v733_v0 = vsel %vm708_vm3, %v730_v58, %v732_v63 }
  0x6c   : > { %905 = vrot.lane.b32.xlu1 %v3446_v45, %s3215_s11 }
  0x6d   : > { %903 = vrot.lane.b32.xlu0 %v3449_v46, %s3215_s11 }
  0x70   : > { %965 = vrot.lane.b32.xlu1 %v667_v62, %s3216_s12  ;;  %v682_v62 = vsel %vm657_vm2, %v679_v53, %v681_v59 }
  0x71   : > { %963 = vrot.lane.b32.xlu0 %v665_v57, %s3216_s12  ;;  %v729_v57 = vrot.slane %v3585_v49, 2 }
  0x73   : > { %v731_v60 = vsel %vm708_vm3, %v729_v57, %v730_v58 }
  0x74   : > { %847 = vrot.lane.b32.xlu1 %v716_v12, %s3214_s10 }
  0x75   : > { %1023 = vrot.lane.b32.xlu0 %v716_v12, %s3217_s13 }
  0x78   : > { %1083 = vrot.lane.b32.xlu1 %v3473_v61, %s3218_s14 }
  0x79   : > { %1025 = vrot.lane.b32.xlu0 %v718_v14, %s3217_s13 }
  0x7c   : > { %907 = vrot.lane.b32.xlu1 %v3473_v61, %s3215_s11 }
  0x7d   : > { %849 = vrot.lane.b32.xlu0 %v718_v14, %s3214_s10 }
  0x80   : > { %1143 = vrot.lane.b32.xlu1 %v670_v6, %s3219_s29 }
  0x81   : > { %1085 = vrot.lane.b32.xlu0 %v3464_v56, %s3218_s14 }
  0x84   : > { %967 = vrot.lane.b32.xlu1 %v670_v6, %s3216_s12 }
  0x85   : > { %909 = vrot.lane.b32.xlu0 %v3464_v56, %s3215_s11 }
  0x88   : > { %1203 = vrot.lane.b32.xlu1 %v721_v22, %s3220_s17 }
  0x89   : > { %1145 = vrot.lane.b32.xlu0 %v672_v3, %s3219_s29 }
  0x8c   : > { %1027 = vrot.lane.b32.xlu1 %v721_v22, %s3217_s13 }
  0x8d   : > { %969 = vrot.lane.b32.xlu0 %v672_v3, %s3216_s12  ;;  %v558_v3 = vrot.slane %v504_v1, 7 }
  0x8f   : > { %v3624_v7 = vsel %vm542_vm1, 0.0, %v558_v3  ;;  %v3629_v9 = vsel %vm542_vm1, %v558_v3, %v559_v5  ;;  %v631_v5 = vsel %vm542_vm1, %v562_v40, 0.0 }
  0x90   : > { %851 = vrot.lane.b32.xlu1 %v721_v22, %s3214_s10  ;;  %v683_v11 = vrot.slane %v3624_v7, 1  ;;  %v684_v12 = vrot.slane %v3629_v9, 1  ;;  %v734_v19 = vrot.slane %v3624_v7, 2  ;;  %v735_v20 = vrot.slane %v3629_v9, 2 }
  0x91   : > { %1205 = vrot.lane.b32.xlu0 %v723_v27, %s3220_s17  ;;  %v686_v22 = vrot.slane %v630_v18, 1  ;;  %v691_v18 = vrot.slane %v631_v5, 1 }
  0x92   : > { %v685_v15 = vsel %vm657_vm2, %v683_v11, %v684_v12  ;;  %v736_v24 = vsel %vm708_vm3, %v734_v19, %v735_v20 }
  0x93   : > { %v687_v26 = vsel %vm657_vm2, %v684_v12, %v686_v22 }
  0x94   : > { %1087 = vrot.lane.b32.xlu1 %v3548_v29, %s3218_s14 }
  0x95   : > { %1029 = vrot.lane.b32.xlu0 %v723_v27, %s3217_s13 }
  0x98   : > { %911 = vrot.lane.b32.xlu1 %v3548_v29, %s3215_s11 }
  0x99   : > { %853 = vrot.lane.b32.xlu0 %v723_v27, %s3214_s10 }
  0x9c   : > { %1147 = vrot.lane.b32.xlu1 %v675_v33, %s3219_s29 }
  0x9d   : > { %1089 = vrot.lane.b32.xlu0 %v3551_v30, %s3218_s14 }
  0xa0   : > { %971 = vrot.lane.b32.xlu1 %v675_v33, %s3216_s12 }
  0xa1   : > { %913 = vrot.lane.b32.xlu0 %v3551_v30, %s3215_s11 }
  0xa4   : > { %1207 = vrot.lane.b32.xlu1 %v726_v38, %s3220_s17 }
  0xa5   : > { %1149 = vrot.lane.b32.xlu0 %v677_v39, %s3219_s29 }
  0xa8   : > { %973 = vrot.lane.b32.xlu1 %v677_v39, %s3216_s12 }
  0xa9   : > { %795 = vrot.lane.b32.xlu0 %v675_v33, %s3213_s9  ;;  %v738_v33 = vsel %vm708_vm3, %v735_v20, %v737_v28  ;;  %v742_v28 = vrot.slane %v631_v5, 2 }
  0xac   : > { %1209 = vrot.lane.b32.xlu1 %v728_v41, %s3220_s17 }
  0xad   : > { %1031 = vrot.lane.b32.xlu0 %v726_v38, %s3217_s13 }
  0xb0   : > { %855 = vrot.lane.b32.xlu1 %v726_v38, %s3214_s10  ;;  %v561_v38 = vrot.slane %v506_v35, 7 }
  0xb1   : > { %797 = vrot.lane.b32.xlu0 %v677_v39, %s3213_s9 }
  0xb2   : > { %v3683_v42 = vsel %vm542_vm1, 0.0, %v561_v38  ;;  %v3686_v44 = vsel %vm542_vm1, %v561_v38, %v562_v40  ;;  %v509_v38 = vld [vmem:[%s3437_s7 + $0x78] sm:$0xff] }
  0xb3   : > { %v689_v55 = vrot.slane %v3686_v44, 1  ;;  %v739_v11 = vrot.slane %v3683_v42, 2  ;;  %v740_v12 = vrot.slane %v3686_v44, 2 }
  0xb4   : > { %1091 = vrot.lane.b32.xlu1 %v3585_v49, %s3218_s14 }
  0xb5   : > { %1033 = vrot.lane.b32.xlu0 %v728_v41, %s3217_s13 }
  0xb8   : > { %915 = vrot.lane.b32.xlu1 %v3585_v49, %s3215_s11 }
  0xb9   : > { %857 = vrot.lane.b32.xlu0 %v728_v41, %s3214_s10 }
  0xbc   : > { %1151 = vrot.lane.b32.xlu1 %v680_v54, %s3219_s29 }
  0xbd   : > { %1093 = vrot.lane.b32.xlu0 %v3588_v50, %s3218_s14 }
  0xc0   : > { %975 = vrot.lane.b32.xlu1 %v680_v54, %s3216_s12 }
  0xc1   : > { %917 = vrot.lane.b32.xlu0 %v3588_v50, %s3215_s11 }
  0xc4   : > { %1211 = vrot.lane.b32.xlu1 %v731_v60, %s3220_s17 }
  0xc5   : > { %1153 = vrot.lane.b32.xlu0 %v682_v62, %s3219_s29 }
  0xc8   : > { %977 = vrot.lane.b32.xlu1 %v682_v62, %s3216_s12 }
  0xc9   : > { %799 = vrot.lane.b32.xlu0 %v680_v54, %s3213_s9  ;;  %v688_v54 = vrot.slane %v3683_v42, 1 }
  0xcb   : > { %v690_v63 = vsel %vm657_vm2, %v688_v54, %v689_v55 }
  0xcc   : > { %1213 = vrot.lane.b32.xlu1 %v733_v0, %s3220_s17 }
  0xcd   : > { %1035 = vrot.lane.b32.xlu0 %v731_v60, %s3217_s13 }
  0xce   : > { %v3619_v4 = vpop.permute.xlu1 %787 }
  0xcf   : > { %v784_v6 = vpop.permute.xlu0 %783 }
  0xd0   : > { %859 = vrot.lane.b32.xlu1 %v731_v60, %s3214_s10  ;;  %v1264_v52 = vsel %vm1263_vm5, %v3452_v47, %v784_v6 }
  0xd1   : > { %801 = vrot.lane.b32.xlu0 %v682_v62, %s3213_s9 }
  0xd2   : > { %v3626_v8 = vpop.permute.xlu1 %789 }
  0xd3   : > { %v3631_v10 = vpop.permute.xlu0 %785  ;;  %v1267_v5 = vsel %vm1263_vm5, %v3446_v45, %v3626_v8 }
  0xd4   : > { %1095 = vrot.lane.b32.xlu1 %v3624_v7, %s3218_s14  ;;  %v1265_v6 = vsel %vm1263_vm5, %v3458_v51, %v3631_v10 }
  0xd5   : > { %1037 = vrot.lane.b32.xlu0 %v733_v0, %s3217_s13 }
  0xd6   : > { %v3638_v13 = vpop.permute.xlu1 %793 }
  0xd7   : > { %v3640_v14 = vpop.permute.xlu0 %791 }
  0xd8   : > { %919 = vrot.lane.b32.xlu1 %v3624_v7, %s3215_s11 }
  0xd9   : > { %861 = vrot.lane.b32.xlu0 %v733_v0, %s3214_s10 }
  0xda   : > { %v3646_v16 = vpop.permute.xlu1 %845 }
  0xdb   : > { %v844_v17 = vpop.permute.xlu0 %843 }
  0xdc   : > { %1155 = vrot.lane.b32.xlu1 %v685_v15, %s3219_s29  ;;  %v1285_v53 = vsel %vm1284_vm6, %v1264_v52, %v844_v17 }
  0xdd   : > { %1097 = vrot.lane.b32.xlu0 %v3629_v9, %s3218_s14 }
  0xde   : > { %v3654_v21 = vpop.permute.xlu1 %905 }
  0xdf   : > { %v904_v23 = vpop.permute.xlu0 %903 }
  0xe0   : > { %979 = vrot.lane.b32.xlu1 %v685_v15, %s3216_s12  ;;  %v1306_v57 = vsel %vm1305_vm7, %v1285_v53, %v904_v23  ;;  %v692_v23 = vsel %vm657_vm2, %v689_v55, %v691_v18  ;;  %v1266_v53 = vsel %vm1263_vm5, %v3449_v46, %v3619_v4 }
  0xe1   : > { %921 = vrot.lane.b32.xlu0 %v3629_v9, %s3215_s11 }
  0xe2   : > { %v3660_v25 = vpop.permute.xlu1 %965 }
  0xe3   : > { %v964_v27 = vpop.permute.xlu0 %963 }
  0xe4   : > { %1215 = vrot.lane.b32.xlu1 %v736_v24, %s3220_s17  ;;  %v1327_v47 = vsel %vm1326_vm8, %v1306_v57, %v964_v27 }
  0xe5   : > { %1157 = vrot.lane.b32.xlu0 %v687_v26, %s3219_s29 }
  0xe6   : > { %v3665_v31 = vpop.permute.xlu1 %847 }
  0xe7   : > { %v1024_v32 = vpop.permute.xlu0 %1023  ;;  %v1287_v55 = vsel %vm1284_vm6, %v1266_v53, %v3665_v31 }
  0xe8   : > { %981 = vrot.lane.b32.xlu1 %v687_v26, %s3216_s12  ;;  %v1348_v60 = vsel %vm1347_vm9, %v1327_v47, %v1024_v32 }
  0xe9   : > { %803 = vrot.lane.b32.xlu0 %v685_v15, %s3213_s9  ;;  %v1286_v15 = vsel %vm1284_vm6, %v1265_v6, %v3646_v16  ;;  %v741_v16 = vsel %vm708_vm3, %v739_v11, %v740_v12 }
  0xea   : > { %v1084_v34 = vpop.permute.xlu1 %1083  ;;  %v1307_v51 = vsel %vm1305_vm7, %v1286_v15, %v3654_v21 }
  0xeb   : > { %v3671_v36 = vpop.permute.xlu0 %1025  ;;  %v1369_v62 = vsel %vm1368_vm10, %v1348_v60, %v1084_v34  ;;  %v1328_v19 = vsel %vm1326_vm8, %v1307_v51, %v3660_v25  ;;  %v743_v34 = vsel %vm708_vm3, %v740_v12, %v742_v28 }
  0xec   : > { %1217 = vrot.lane.b32.xlu1 %v738_v33, %s3220_s17  ;;  %v1349_v20 = vsel %vm1347_vm9, %v1328_v19, %v3671_v36  ;;  %v508_v36 = vld [vmem:[%s3437_s7 + $0x70] sm:$0xff] }
  0xed   : > { %1039 = vrot.lane.b32.xlu0 %v736_v24, %s3217_s13  ;;  %v564_v40 = vrot.slane %v508_v36, 7  ;;  %v510_v36 = vld [vmem:[%s3437_s7 + $0x80] sm:$0xff] }
  0xee   : > { %v3676_v39 = vpop.permute.xlu1 %907 }
  0xef   : > { %v3678_v41 = vpop.permute.xlu0 %849  ;;  %v3768_v57 = vsel %vm542_vm1, 0.0, %v564_v40  ;;  %v1308_v47 = vsel %vm1305_vm7, %v1287_v55, %v3676_v39 }
  0xf0   : > { %863 = vrot.lane.b32.xlu1 %v736_v24, %s3214_s10  ;;  %v693_v39 = vrot.slane %v3768_v57, 1  ;;  %v1288_v6 = vsel %vm1284_vm6, %v1267_v5, %v3678_v41 }
  0xf1   : > { %805 = vrot.lane.b32.xlu0 %v687_v26, %s3213_s9  ;;  %v400_v26 = vstv %s399_s16 }
  0xf2   : > { %v1144_v43 = vpop.permute.xlu1 %1143  ;;  %3150 = vrcp.f32 %v400_v26 }
  0xf3   : > { %v1086_v48 = vpop.permute.xlu0 %1085  ;;  %v1390_v0 = vsel %vm1389_vm11, %v1369_v62, %v1144_v43 }
  0xf4   : > { %1099 = vrot.lane.b32.xlu1 %v3683_v42, %s3218_s14  ;;  %v1370_v22 = vsel %vm1368_vm10, %v1349_v20, %v1086_v48  ;;  %v565_v48 = vrot.slane %v509_v38, 7 }
  0xf5   : > { %1041 = vrot.lane.b32.xlu0 %v738_v33, %s3217_s13 }
  0xf6   : > { %v3697_v58 = vpop.permute.xlu1 %967  ;;  %v3775_v62 = vsel %vm542_vm1, %v564_v40, %v565_v48  ;;  %v511_v40 = vld [vmem:[%s3437_s7 + $0x88] sm:$0xff] }
  0xf7   : > { %v3700_v59 = vpop.permute.xlu0 %909  ;;  %v1329_v46 = vsel %vm1326_vm8, %v1308_v47, %v3697_v58  ;;  %v745_v51 = vrot.slane %v3775_v62, 2 }
  0xf8   : > { %923 = vrot.lane.b32.xlu1 %v3683_v42, %s3215_s11  ;;  %v1309_v12 = vsel %vm1305_vm7, %v1288_v6, %v3700_v59  ;;  %v744_v59 = vrot.slane %v3768_v57, 2 }
  0xf9   : > { %865 = vrot.lane.b32.xlu0 %v738_v33, %s3214_s10 }
  0xfa   : > { %v1204_v1 = vpop.permute.xlu1 %1203 }
  0xfb   : > { %v1146_v2 = vpop.permute.xlu0 %1145  ;;  %v1411_v3 = vsel %vm1410_vm12, %v1390_v0, %v1204_v1  ;;  %v694_v0 = vrot.slane %v3775_v62, 1 }
  0xfc   : > { %1159 = vrot.lane.b32.xlu1 %v690_v63, %s3219_s29  ;;  %3021 = vmatprep.mubr.msk.f32.mxu0 %vm1436_vm13, %v1411_v3  ;;  %v1391_v24 = vsel %vm1389_vm11, %v1370_v22, %v1146_v2 }
  0xfd   : > { %1101 = vrot.lane.b32.xlu0 %v3686_v44, %s3218_s14  ;;  %v695_v11 = vsel %vm657_vm2, %v693_v39, %v694_v0 }
  0xfe   : > { %v1028_v17 = vpop.permute.xlu1 %1027 }
  0xff   : > { %v3728_v10 = vpop.permute.xlu0 %969  ;;  %v3151_v54 = vpop.eup %3150  ;;  %v1350_v31 = vsel %vm1347_vm9, %v1329_v46, %v1028_v17  ;;  %v632_v17 = vsel %vm542_vm1, %v565_v48, 0.0 }
 0x100   : > { %983 = vrot.lane.b32.xlu1 %v690_v63, %s3216_s12  ;;  %3086 = vpush %v3151_v54  ;;  %v1330_v45 = vsel %vm1326_vm8, %v1309_v12, %v3728_v10  ;;  %v696_v20 = vrot.slane %v632_v17, 1  ;;  %v1268_v54 = vsel %vm1263_vm5, %v3473_v61, %v3640_v14 }
 0x101   : > { %925 = vrot.lane.b32.xlu0 %v3686_v44, %s3215_s11 }
 0x102   : > { %v3741_v21 = vpop.permute.xlu1 %851 }
 0x103   : > { %v1206_v25 = vpop.permute.xlu0 %1205  ;;  %v1289_v55 = vsel %vm1284_vm6, %v1268_v54, %v3741_v21 }
 0x104   : > { %v1412_v27 = vsel %vm1410_vm12, %v1391_v24, %v1206_v25  ;;  %1219 = vrot.lane.b32.xlu1 %v741_v16, %s3220_s17  ;;  %v697_v25 = vsel %vm657_vm2, %v694_v0, %v696_v20 }
 0x105   : > { %1161 = vrot.lane.b32.xlu0 %v692_v23, %s3219_s29  ;;  %3022 = vmatmul.mubr.msk.f32.vlgmr.msra.gmra.mxu0 %vm1436_vm13, %v1412_v27  ;;  %v747_v27 = vrot.slane %v632_v17, 2 }
 0x106   : > { %v1088_v32 = vpop.permute.xlu1 %1087 }
 0x107   : > { %v1030_v33 = vpop.permute.xlu0 %1029 }
 0x108   : > { %985 = vrot.lane.b32.xlu1 %v692_v23, %s3216_s12  ;;  %v1351_v18 = vsel %vm1347_vm9, %v1330_v45, %v1030_v33  ;;  %v748_v33 = vsel %vm708_vm3, %v745_v51, %v747_v27 }
 0x109   : > { %807 = vrot.lane.b32.xlu0 %v690_v63, %s3213_s9  ;;  %v1371_v63 = vsel %vm1368_vm10, %v1350_v31, %v1088_v32 }
 0x10a   : > { %v3752_v35 = vpop.permute.xlu1 %911 }
 0x10b   : > { %v3755_v37 = vpop.permute.xlu0 %853  ;;  %v1310_v46 = vsel %vm1305_vm7, %v1289_v55, %v3752_v35 }
 0x10c   : > { %1221 = vrot.lane.b32.xlu1 %v743_v34, %s3220_s17 }
 0x10d   : > { %1043 = vrot.lane.b32.xlu0 %v741_v16, %s3217_s13 }
 0x10e   : > { %v1148_v43 = vpop.permute.xlu1 %1147 }
 0x10f   : > { %v1090_v52 = vpop.permute.xlu0 %1089  ;;  %v1392_v1 = vsel %vm1389_vm11, %v1371_v63, %v1148_v43  ;;  %v567_v43 = vrot.slane %v510_v36, 7 }
 0x110   : > { %867 = vrot.lane.b32.xlu1 %v741_v16, %s3214_s10  ;;  %v1372_v41 = vsel %vm1368_vm10, %v1351_v18, %v1090_v52  ;;  %v568_v52 = vrot.slane %v511_v40, 7  ;;  %v513_v40 = vld [vmem:[%s3437_s7 + $0x98] sm:$0xff] }
 0x111   : > { %809 = vrot.lane.b32.xlu0 %v692_v23, %s3213_s9  ;;  %v746_v23 = vsel %vm708_vm3, %v744_v59, %v745_v51  ;;  %v3849_v47 = vsel %vm542_vm1, 0.0, %v567_v43 }
 0x112   : > { %v3772_v60 = vpop.permute.xlu1 %971  ;;  %v3856_v63 = vsel %vm542_vm1, %v567_v43, %v568_v52  ;;  %v698_v35 = vrot.slane %v3849_v47, 1  ;;  %v633_v45 = vsel %vm542_vm1, %v568_v52, 0.0  ;;  %v571_v52 = vrot.slane %v513_v40, 7 }
 0x113   : > { %v3779_v4 = vpop.permute.xlu0 %913  ;;  %v1331_v61 = vsel %vm1326_vm8, %v1310_v46, %v3772_v60  ;;  %v699_v0 = vrot.slane %v3856_v63, 1  ;;  %v750_v18 = vrot.slane %v3856_v63, 2  ;;  %v701_v59 = vrot.slane %v633_v45, 1 }
 0x114   : > { %1103 = vrot.lane.b32.xlu1 %v3768_v57, %s3218_s14 }
 0x115   : > { %1045 = vrot.lane.b32.xlu0 %v743_v34, %s3217_s13  ;;  %v700_v6 = vsel %vm657_vm2, %v698_v35, %v699_v0 }
 0x116   : > { %v1208_v2 = vpop.permute.xlu1 %1207 }
 0x117   : > { %v1413_v58 = vsel %vm1410_vm12, %v1392_v1, %v1208_v2  ;;  %v1150_v3 = vpop.permute.xlu0 %1149 }
 0x118   : > { %927 = vrot.lane.b32.xlu1 %v3768_v57, %s3215_s11  ;;  %3024 = vmatprep.mubr.msk.f32.mxu0 %vm1436_vm13, %v1413_v58  ;;  %v1393_v19 = vsel %vm1389_vm11, %v1372_v41, %v1150_v3  ;;  %v1269_v3 = vsel %vm1263_vm5, %v3464_v56, %v3638_v13 }
 0x119   : > { %869 = vrot.lane.b32.xlu0 %v743_v34, %s3214_s10  ;;  %v1290_v5 = vsel %vm1284_vm6, %v1269_v3, %v3755_v37 }
 0x11a   : > { %v3802_v15 = vpop.permute.xlu1 %973 }
 0x11b   : > { %v3806_v8 = vpop.permute.xlu0 %795 }
 0x11c   : > { %1163 = vrot.lane.b32.xlu1 %v695_v11, %s3219_s29  ;;  %v1270_v54 = vsel %vm1263_vm5, %v3548_v29, %v3806_v8 }
 0x11d   : > { %1105 = vrot.lane.b32.xlu0 %v3775_v62, %s3218_s14 }
 0x11e   : > { %v1210_v10 = vpop.permute.xlu1 %1209 }
 0x11f   : > { %v1414_v16 = vsel %vm1410_vm12, %v1393_v19, %v1210_v10  ;;  %v1032_v22 = vpop.permute.xlu0 %1031 }
 0x120   : > { %987 = vrot.lane.b32.xlu1 %v695_v11, %s3216_s12  ;;  %3025 = vmatmul.mubr.msk.f32.gmra.mxu0 %vm1436_vm13, %v1414_v16  ;;  %v1352_v21 = vsel %vm1347_vm9, %v1331_v61, %v1032_v22  ;;  %v702_v16 = vsel %vm657_vm2, %v699_v0, %v701_v59 }
 0x121   : > { %929 = vrot.lane.b32.xlu0 %v3775_v62, %s3215_s11 }
 0x122   : > { %v3823_v24 = vpop.permute.xlu1 %855 }
 0x123   : > { %v3826_v26 = vpop.permute.xlu0 %797  ;;  %v1291_v55 = vsel %vm1284_vm6, %v1270_v54, %v3823_v24 }
 0x124   : > { %1223 = vrot.lane.b32.xlu1 %v746_v23, %s3220_s17 }
 0x125   : > { %1165 = vrot.lane.b32.xlu0 %v697_v25, %s3219_s29 }
 0x126   : > { %v1092_v28 = vpop.permute.xlu1 %1091 }
 0x127   : > { %v1034_v32 = vpop.permute.xlu0 %1033  ;;  %v1373_v39 = vsel %vm1368_vm10, %v1352_v21, %v1092_v28 }
 0x128   : > { %989 = vrot.lane.b32.xlu1 %v697_v25, %s3216_s12 }
 0x129   : > { %811 = vrot.lane.b32.xlu0 %v695_v11, %s3213_s9  ;;  %v1311_v11 = vsel %vm1305_vm7, %v1290_v5, %v3779_v4  ;;  %v749_v4 = vrot.slane %v3849_v47, 2 }
 0x12a   : > { %v3833_v34 = vpop.permute.xlu1 %915  ;;  %v1332_v56 = vsel %vm1326_vm8, %v1311_v11, %v3802_v15 }
 0x12b   : > { %v3836_v38 = vpop.permute.xlu0 %857  ;;  %v1353_v17 = vsel %vm1347_vm9, %v1332_v56, %v1034_v32  ;;  %v751_v10 = vsel %vm708_vm3, %v749_v4, %v750_v18  ;;  %v1312_v61 = vsel %vm1305_vm7, %v1291_v55, %v3833_v34  ;;  %v634_v56 = vsel %vm542_vm1, %v571_v52, 0.0 }
 0x12c   : > { %1225 = vrot.lane.b32.xlu1 %v748_v33, %s3220_s17  ;;  %v706_v4 = vrot.slane %v634_v56, 1 }
 0x12d   : > { %1047 = vrot.lane.b32.xlu0 %v746_v23, %s3217_s13 }
 0x12e   : > { %v1152_v48 = vpop.permute.xlu1 %1151 }
 0x12f   : > { %v1094_v53 = vpop.permute.xlu0 %1093  ;;  %v1394_v1 = vsel %vm1389_vm11, %v1373_v39, %v1152_v48 }
 0x130   : > { %871 = vrot.lane.b32.xlu1 %v746_v23, %s3214_s10  ;;  %v1374_v37 = vsel %vm1368_vm10, %v1353_v17, %v1094_v53  ;;  %v752_v23 = vrot.slane %v633_v45, 2 }
 0x131   : > { %813 = vrot.lane.b32.xlu0 %v697_v25, %s3213_s9  ;;  %s3988_s18 = spop %3086 }
 0x132   : > { %v3853_v31 = vpop.permute.xlu1 %975  ;;  %v753_v28 = vsel %vm708_vm3, %v750_v18, %v752_v23  ;;  %s404_s23 = smul.f32 %s3988_s18, %s3724_s19  ;;  %v757_v23 = vrot.slane %v634_v56, 2 }
 0x133   : > { %v3860_v14 = vpop.permute.xlu0 %917  ;;  %v1333_v29 = vsel %vm1326_vm8, %v1312_v61, %v3853_v31  ;;  %s403_s28 = smul.f32 %s3988_s18, %s3720_s30 }
 0x134   : > { %1107 = vrot.lane.b32.xlu1 %v3849_v47, %s3218_s14 }
 0x135   : > { %1049 = vrot.lane.b32.xlu0 %v748_v33, %s3217_s13 }
 0x136   : > { %v1212_v2 = vpop.permute.xlu1 %1211 }
 0x137   : > { %v1415_v60 = vsel %vm1410_vm12, %v1394_v1, %v1212_v2  ;;  %v1154_v58 = vpop.permute.xlu0 %1153 }
 0x138   : > { %931 = vrot.lane.b32.xlu1 %v3849_v47, %s3215_s11  ;;  %3027 = vmatprep.mubr.msk.f32.mxu0 %vm1436_vm13, %v1415_v60  ;;  %v1395_v41 = vsel %vm1389_vm11, %v1374_v37, %v1154_v58  ;;  %v1271_v58 = vsel %vm1263_vm5, %v3551_v30, %v3826_v26 }
 0x139   : > { %873 = vrot.lane.b32.xlu0 %v748_v33, %s3214_s10  ;;  %v512_v33 = vld [vmem:[%s3437_s7 + $0x90] sm:$0xff]  ;;  %v1292_v3 = vsel %vm1284_vm6, %v1271_v58, %v3836_v38  ;;  %v2906_v58 = vld [vmem:[%s3984_s27 + $0x48] sm:$0xff] }
 0x13a   : > { %v3883_v12 = vpop.permute.xlu1 %977  ;;  %v570_v43 = vrot.slane %v512_v33, 7 }
 0x13b   : > { %v3887_v13 = vpop.permute.xlu0 %799 }
 0x13c   : > { %1167 = vrot.lane.b32.xlu1 %v700_v6, %s3219_s29  ;;  %v3930_v46 = vsel %vm542_vm1, 0.0, %v570_v43  ;;  %v3937_v39 = vsel %vm542_vm1, %v570_v43, %v571_v52  ;;  %v2903_v52 = vld [vmem:[%s3984_s27 + $0x30] sm:$0xff] }
 0x13d   : > { %1109 = vrot.lane.b32.xlu0 %v3856_v63, %s3218_s14  ;;  %v703_v34 = vrot.slane %v3930_v46, 1  ;;  %v704_v0 = vrot.slane %v3937_v39, 1  ;;  %v755_v17 = vrot.slane %v3937_v39, 2  ;;  %v446_v61 = vmul.f32 0.25, %v2903_v52 }
 0x13e   : > { %v1214_v15 = vpop.permute.xlu1 %1213 }
 0x13f   : > { %v1416_v51 = vsel %vm1410_vm12, %v1395_v41, %v1214_v15  ;;  %v1036_v19 = vpop.permute.xlu0 %1035  ;;  %v705_v5 = vsel %vm657_vm2, %v703_v34, %v704_v0 }
 0x140   : > { %991 = vrot.lane.b32.xlu1 %v700_v6, %s3216_s12  ;;  %3028 = vmatmul.mubr.msk.f32.gmra.mxu0 %vm1436_vm13, %v1416_v51  ;;  %v1354_v24 = vsel %vm1347_vm9, %v1333_v29, %v1036_v19  ;;  %v3998_v51 = vsel %vm657_vm2, %v704_v0, %v706_v4  ;;  %v4001_v19 = vld [vmem:[%s3984_s27 + $0x18] sm:$0xff]  ;;  %v514_v0 = vld [vmem:[%s3437_s7 + $0xa0] sm:$0xff]  ;;  %v2907_v4 = vld [vmem:[%s3984_s27 + $0x50] sm:$0xff] }
 0x141   : > { %933 = vrot.lane.b32.xlu0 %v3856_v63, %s3215_s11  ;;  %v4018_v33 = vmul.f32 0.25, %v4001_v19 }
 0x142   : > { %v3904_v20 = vpop.permute.xlu1 %859 }
 0x143   : > { %v3907_v22 = vpop.permute.xlu0 %801 }
 0x144   : > { %1227 = vrot.lane.b32.xlu1 %v751_v10, %s3220_s17 }
 0x145   : > { %1169 = vrot.lane.b32.xlu0 %v702_v16, %s3219_s29 }
 0x146   : > { %v1096_v25 = vpop.permute.xlu1 %1095 }
 0x147   : > { %v1038_v27 = vpop.permute.xlu0 %1037  ;;  %v1375_v35 = vsel %vm1368_vm10, %v1354_v24, %v1096_v25  ;;  %v2902_v25 = vld [vmem:[%s3984_s27 + $0x28] sm:$0xff] }
 0x148   : > { %993 = vrot.lane.b32.xlu1 %v702_v16, %s3216_s12  ;;  %v4023_v43 = vmul.f32 0.25, %v2902_v25 }
 0x149   : > { %815 = vrot.lane.b32.xlu0 %v700_v6, %s3213_s9  ;;  %v1313_v6 = vsel %vm1305_vm7, %v1292_v3, %v3860_v14  ;;  %v754_v14 = vrot.slane %v3930_v46, 2  ;;  %v2905_v3 = vld [vmem:[%s3984_s27 + $0x40] sm:$0xff] }
 0x14a   : > { %v3914_v32 = vpop.permute.xlu1 %919  ;;  %v1334_v30 = vsel %vm1326_vm8, %v1313_v6, %v3883_v12  ;;  %v4043_v6 = vsel %vm708_vm3, %v755_v17, %v757_v23  ;;  %v573_v23 = vrot.slane %v514_v0, 7 }
 0x14b   : > { %v3917_v36 = vpop.permute.xlu0 %861  ;;  %v1355_v45 = vsel %vm1347_vm9, %v1334_v30, %v1038_v27  ;;  %v3993_v15 = vsel %vm708_vm3, %v754_v14, %v755_v17  ;;  %v2901_v27 = vld [vmem:[%s3984_s27 + $0x20] sm:$0xff]  ;;  %v4046_v30 = vld [vmem:[%s3437_s7 + $0xa8] sm:$0xff]  ;;  %v476_v17 = vmul.f32 0.75, %v2903_v52 }
 0x14c   : > { %1229 = vrot.lane.b32.xlu1 %v753_v28, %s3220_s17  ;;  %v474_v54 = vmul.f32 0.75, %v2901_v27 }
 0x14d   : > { %1051 = vrot.lane.b32.xlu0 %v751_v10, %s3217_s13 }
 0x14e   : > { %v1156_v48 = vpop.permute.xlu1 %1155 }
 0x14f   : > { %v1098_v53 = vpop.permute.xlu0 %1097  ;;  %v1396_v1 = vsel %vm1389_vm11, %v1375_v35, %v1156_v48  ;;  %v475_v48 = vmul.f32 0.75, %v2902_v25  ;;  %v4030_v35 = vstv %s404_s23 }
 0x150   : > { %875 = vrot.lane.b32.xlu1 %v751_v10, %s3214_s10  ;;  %v1376_v38 = vsel %vm1368_vm10, %v1355_v45, %v1098_v53  ;;  %v4004_v10 = vld [vmem:[%s3984_s27 + $0x10] sm:$0xff] }
 0x151   : > { %817 = vrot.lane.b32.xlu0 %v702_v16, %s3213_s9  ;;  %v4021_v40 = vmul.f32 0.25, %v4004_v10  ;;  %v485_v34 = vadd.f32 %v475_v48, %v4018_v33 }
 0x152   : > { %v3934_v21 = vpop.permute.xlu1 %979 }
 0x153   : > { %v3941_v8 = vpop.permute.xlu0 %921  ;;  %v4049_v56 = vmul.f32 %v4030_v35, %v485_v34  ;;  %v479_v34 = vmul.f32 0.75, %v2906_v58 }
 0x154   : > { %1111 = vrot.lane.b32.xlu1 %v3930_v46, %s3218_s14 }
 0x155   : > { %1053 = vrot.lane.b32.xlu0 %v753_v28, %s3217_s13  ;;  %5116 = vst [vmem:[#allocation6_spill] sm:$0xff] %v4049_v56 }
 0x156   : > { %v1216_v2 = vpop.permute.xlu1 %1215 }
 0x157   : > { %v1417_v31 = vsel %vm1410_vm12, %v1396_v1, %v1216_v2  ;;  %v1158_v60 = vpop.permute.xlu0 %1157  ;;  %v4036_v1 = vmul.f32 0.25, %v2901_v27  ;;  %v484_v2 = vadd.f32 %v474_v54, %v4021_v40  ;;  %v449_v27 = vmul.f32 0.25, %v2906_v58 }
 0x158   : > { %935 = vrot.lane.b32.xlu1 %v3930_v46, %s3215_s11  ;;  %3030 = vmatprep.mubr.msk.f32.mxu0 %vm1436_vm13, %v1417_v31  ;;  %v1397_v12 = vsel %vm1389_vm11, %v1376_v38, %v1158_v60  ;;  %v456_v60 = vadd.f32 %v474_v54, %v446_v61 }
 0x159   : > { %877 = vrot.lane.b32.xlu0 %v753_v28, %s3214_s10  ;;  %v2904_v28 = vld [vmem:[%s3984_s27 + $0x38] sm:$0xff]  ;;  %v4055_v14 = vmul.f32 %v4030_v35, %v484_v2  ;;  %v486_v54 = vadd.f32 %v476_v17, %v4036_v1  ;;  %v478_v2 = vmul.f32 0.75, %v2905_v3 }
 0x15a   : > { %v3964_v11 = vpop.permute.xlu1 %981  ;;  %v447_v55 = vmul.f32 0.25, %v2904_v28  ;;  %v477_v29 = vmul.f32 0.75, %v2904_v28  ;;  %v448_v28 = vmul.f32 0.25, %v2905_v3 }
 0x15b   : > { %v3968_v26 = vpop.permute.xlu0 %803  ;;  %5117 = vst [vmem:[#allocation7_spill] sm:$0xff] %v4055_v14 }
 0x15c   : > { %1171 = vrot.lane.b32.xlu1 %v705_v5, %s3219_s29  ;;  %v457_v31 = vadd.f32 %v475_v48, %v447_v55  ;;  %v487_v45 = vadd.f32 %v477_v29, %v4023_v43  ;;  %v574_v48 = vrot.slane %v4046_v30, 7  ;;  %v459_v52 = vadd.f32 %v477_v29, %v449_v27 }
 0x15d   : > { %1113 = vrot.lane.b32.xlu0 %v3937_v39, %s3218_s14  ;;  %v623_v30 = vsel %vm542_vm1, 0.0, %v573_v23 }
 0x15e   : > { %v1218_v37 = vpop.permute.xlu1 %1217  ;;  %v4068_v25 = vmul.f32 %v4030_v35, %v487_v45  ;;  %v4081_v58 = vmul.f32 %v4030_v35, %v459_v52 }
 0x15f   : > { %v1418_v18 = vsel %vm1410_vm12, %v1397_v12, %v1218_v37  ;;  %v3981_v41 = vpop.permute.xlu0 %1039  ;;  %v4058_v12 = vmul.f32 %v4030_v35, %v457_v31  ;;  %v2908_v37 = vld [vmem:[%s3984_s27 + $0x58] sm:$0xff]  ;;  %v458_v31 = vadd.f32 %v476_v17, %v448_v28  ;;  %v1272_v17 = vsel %vm1263_vm5, %v3585_v49, %v3887_v13 }
 0x160   : > { %995 = vrot.lane.b32.xlu1 %v705_v5, %s3216_s12  ;;  %3031 = vmatmul.mubr.msk.f32.gmra.mxu0 %vm1436_vm13, %v1418_v18  ;;  %5120 = vst [vmem:[#allocation10_spill] sm:$0xff] %v4068_v25  ;;  %v451_v0 = vmul.f32 0.25, %v2908_v37  ;;  %v4077_v25 = vmul.f32 %v4030_v35, %v486_v54  ;;  %v481_v14 = vmul.f32 0.75, %v2908_v37  ;;  %v1293_v54 = vsel %vm1284_vm6, %v1272_v17, %v3904_v20 }
 0x161   : > { %937 = vrot.lane.b32.xlu0 %v3937_v39, %s3215_s11  ;;  %5118 = vst [vmem:[#allocation8_spill] sm:$0xff] %v4058_v12  ;;  %v488_v12 = vadd.f32 %v478_v2, %v446_v61  ;;  %v4084_v3 = vmul.f32 %v4030_v35, %v458_v31  ;;  %v480_v13 = vmul.f32 0.75, %v2907_v4 }
 0x162   : > { %v3995_v59 = vpop.permute.xlu1 %863  ;;  %v461_v29 = vadd.f32 %v479_v34, %v451_v0  ;;  %v491_v49 = vadd.f32 %v481_v14, %v449_v27 }
 0x163   : > { %v4006_v16 = vpop.permute.xlu0 %805  ;;  %v4095_v61 = vmul.f32 %v4030_v35, %v488_v12  ;;  %v575_v12 = vsel %vm542_vm1, %v573_v23, %v574_v48  ;;  %v490_v14 = vadd.f32 %v480_v13, %v448_v28  ;;  %v761_v23 = vrot.slane %v623_v30, 1 }
 0x164   : > { %1231 = vrot.lane.b32.xlu1 %v3993_v15, %s3220_s17  ;;  %v762_v27 = vrot.slane %v575_v12, 1 }
 0x165   : > { %1173 = vrot.lane.b32.xlu0 %v3998_v51, %s3219_s29 }
 0x166   : > { %v4026_v53 = vpop.permute.xlu1 %1099 }
 0x167   : > { %v4028_v24 = vpop.permute.xlu0 %1041 }
 0x168   : > { %997 = vrot.lane.b32.xlu1 %v3998_v51, %s3216_s12 }
 0x169   : > { %819 = vrot.lane.b32.xlu0 %v705_v5, %s3213_s9  ;;  %v4061_v5 = vmul.f32 %v4030_v35, %v456_v60  ;;  %v450_v60 = vmul.f32 0.25, %v2907_v4 }
 0x16a   : > { %v4052_v38 = vpop.permute.xlu1 %923 }
 0x16b   : > { %5119 = vst [vmem:[#allocation9_spill] sm:$0xff] %v4061_v5  ;;  %v4065_v18 = vpop.permute.xlu0 %865  ;;  %v489_v5 = vadd.f32 %v479_v34, %v447_v55  ;;  %v460_v37 = vadd.f32 %v478_v2, %v450_v60  ;;  %v4102_v34 = vmul.f32 %v4030_v35, %v461_v29 }
 0x16c   : > { %1233 = vrot.lane.b32.xlu1 %v4043_v6, %s3220_s17 }
 0x16d   : > { %1055 = vrot.lane.b32.xlu0 %v3993_v15, %s3217_s13  ;;  %v4092_v55 = vmul.f32 %v4030_v35, %v489_v5  ;;  %v4110_v2 = vmul.f32 %v4030_v35, %v460_v37  ;;  %v635_v37 = vsel %vm542_vm1, %v574_v48, 0.0 }
 0x16e   : > { %v1160_v45 = vpop.permute.xlu1 %1159  ;;  %v764_v13 = vrot.slane %v635_v37, 1 }
 0x16f   : > { %v1102_v56 = vpop.permute.xlu0 %1101 }
 0x170   : > { %879 = vrot.lane.b32.xlu1 %v3993_v15, %s3214_s10  ;;  %v1314_v15 = vsel %vm1305_vm7, %v1293_v54, %v3914_v32  ;;  %v766_v54 = vrot.slane %v623_v30, 2 }
 0x171   : > { %821 = vrot.lane.b32.xlu0 %v3998_v51, %s3213_s9  ;;  %v1335_v20 = vsel %vm1326_vm8, %v1314_v15, %v3934_v21  ;;  %v4117_v51 = vmul.f32 %v4030_v35, %v491_v49  ;;  %v4127_v21 = vmul.f32 %v4030_v35, %v490_v14  ;;  %v516_v14 = vld [vmem:[%s3437_s7 + $0xb0] sm:$0xff] }
 0x172   : > { %v4106_v5 = vpop.permute.xlu1 %983  ;;  %v1356_v4 = vsel %vm1347_vm9, %v1335_v20, %v3981_v41  ;;  %v1273_v41 = vsel %vm1263_vm5, %v3588_v50, %v3907_v22 }
 0x173   : > { %v4114_v52 = vpop.permute.xlu0 %925  ;;  %v1377_v32 = vsel %vm1368_vm10, %v1356_v4, %v4026_v53  ;;  %v1294_v53 = vsel %vm1284_vm6, %v1273_v41, %v3917_v36  ;;  %v517_v4 = vld [vmem:[%s3437_s7 + $0xb8] sm:$0xff]  ;;  %s2931_s7 = sadd.s32 4294967295, %s3311_s8 }
 0x174   : > { %1115 = vrot.lane.b32.xlu1 %v623_v30, %s3218_s14  ;;  %v1398_v31 = vsel %vm1389_vm11, %v1377_v32, %v1160_v45  ;;  %v763_v45 = vsel %vm657_vm2, %v761_v23, %v762_v27  ;;  %v1315_v29 = vsel %vm1305_vm7, %v1294_v53, %v3941_v8  ;;  %v767_v8 = vrot.slane %v575_v12, 2 }
 0x175   : > { %1057 = vrot.lane.b32.xlu0 %v4043_v6, %s3217_s13  ;;  %v1336_v50 = vsel %vm1326_vm8, %v1315_v29, %v3964_v11  ;;  %v769_v32 = vrot.slane %v635_v37, 2 }
 0x176   : > { %v1220_v0 = vpop.permute.xlu1 %1219  ;;  %v1357_v36 = vsel %vm1347_vm9, %v1336_v50, %v4028_v24  ;;  %v768_v24 = vsel %vm708_vm3, %v766_v54, %v767_v8  ;;  %v1274_v54 = vsel %vm1263_vm5, %v3624_v7, %v3968_v26 }
 0x177   : > { %v1419_v28 = vsel %vm1410_vm12, %v1398_v31, %v1220_v0  ;;  %v1162_v60 = vpop.permute.xlu0 %1161  ;;  %v576_v31 = vrot.slane %v516_v14, 7  ;;  %v577_v0 = vrot.slane %v517_v4, 7 }
 0x178   : > { %939 = vrot.lane.b32.xlu1 %v623_v30, %s3215_s11  ;;  %3033 = vmatprep.mubr.msk.f32.mxu0 %vm1436_vm13, %v1419_v28  ;;  %v765_v30 = vsel %vm657_vm2, %v762_v27, %v764_v13 }
 0x179   : > { %881 = vrot.lane.b32.xlu0 %v4043_v6, %s3214_s10  ;;  %v1378_v6 = vsel %vm1368_vm10, %v1357_v36, %v1102_v56  ;;  %v636_v41 = vsel %vm542_vm1, %v577_v0, 0.0 }
 0x17a   : > { %v4143_v17 = vpop.permute.xlu1 %985  ;;  %v1399_v49 = vsel %vm1389_vm11, %v1378_v6, %v1162_v60  ;;  %v578_v60 = vsel %vm542_vm1, %v576_v31, %v577_v0  ;;  %v776_v50 = vrot.slane %v636_v41, 1  ;;  %v781_v13 = vrot.slane %v636_v41, 2 }
 0x17b   : > { %v4147_v22 = vpop.permute.xlu0 %807  ;;  %v774_v29 = vrot.slane %v578_v60, 1 }
 0x17c   : > { %1175 = vrot.lane.b32.xlu1 %v763_v45, %s3219_s29 }
 0x17d   : > { %1117 = vrot.lane.b32.xlu0 %v575_v12, %s3218_s14 }
 0x17e   : > { %v1222_v11 = vpop.permute.xlu1 %1221 }
 0x17f   : > { %v1420_v15 = vsel %vm1410_vm12, %v1399_v49, %v1222_v11  ;;  %v1044_v48 = vpop.permute.xlu0 %1043  ;;  %v779_v49 = vrot.slane %v578_v60, 2  ;;  %v777_v11 = vsel %vm657_vm2, %v774_v29, %v776_v50 }
 0x180   : > { %999 = vrot.lane.b32.xlu1 %v763_v45, %s3216_s12  ;;  %3034 = vmatmul.mubr.msk.f32.gmra.mxu0 %vm1436_vm13, %v1420_v15  ;;  %v624_v45 = vsel %vm542_vm1, 0.0, %v576_v31 }
 0x181   : > { %941 = vrot.lane.b32.xlu0 %v575_v12, %s3215_s11  ;;  %v770_v12 = vsel %vm708_vm3, %v767_v8, %v769_v32  ;;  %v773_v36 = vrot.slane %v624_v45, 1  ;;  %v1295_v8 = vsel %vm1284_vm6, %v1274_v54, %v3995_v59  ;;  %v782_v32 = vsel %vm708_vm3, %v779_v49, %v781_v13 }
 0x182   : > { %v4161_v56 = vpop.permute.xlu1 %867  ;;  %v1316_v15 = vsel %vm1305_vm7, %v1295_v8, %v4052_v38  ;;  %v1276_v13 = vsel %vm1263_vm5, %v3683_v42, %v4147_v22 }
 0x183   : > { %v4164_v20 = vpop.permute.xlu0 %809  ;;  %v775_v14 = vsel %vm657_vm2, %v773_v36, %v774_v29  ;;  %v1337_v7 = vsel %vm1326_vm8, %v1316_v15, %v4106_v5  ;;  %v1275_v5 = vsel %vm1263_vm5, %v3629_v9, %v4006_v16  ;;  %v1297_v15 = vsel %vm1284_vm6, %v1276_v13, %v4161_v56 }
 0x184   : > { %1235 = vrot.lane.b32.xlu1 %v768_v24, %s3220_s17  ;;  %v1358_v4 = vsel %vm1347_vm9, %v1337_v7, %v1044_v48  ;;  %v1296_v48 = vsel %vm1284_vm6, %v1275_v5, %v4065_v18 }
 0x185   : > { %1177 = vrot.lane.b32.xlu0 %v765_v30, %s3219_s29 }
 0x186   : > { %v1104_v23 = vpop.permute.xlu1 %1103 }
 0x187   : > { %v1046_v28 = vpop.permute.xlu0 %1045  ;;  %v1379_v59 = vsel %vm1368_vm10, %v1358_v4, %v1104_v23  ;;  %v1317_v23 = vsel %vm1305_vm7, %v1296_v48, %v4114_v52  ;;  %v4260_v48 = vld [vmem:[%s3984_s27] sm:$0xff] }
 0x188   : > { %1059 = vrot.lane.b32.xlu1 %v768_v24, %s3217_s13  ;;  %v778_v24 = vrot.slane %v624_v45, 2 }
 0x189   : > { %1001 = vrot.lane.b32.xlu0 %v765_v30, %s3216_s12 }
 0x18a   : > { %v928_v27 = vpop.permute.xlu1 %927  ;;  %v780_v0 = vsel %vm708_vm3, %v778_v24, %v779_v49 }
 0x18b   : > { %v4175_v53 = vpop.permute.xlu0 %869  ;;  %v1318_v24 = vsel %vm1305_vm7, %v1297_v15, %v928_v27  ;;  %v1277_v27 = vsel %vm1263_vm5, %v3686_v44, %v4164_v20  ;;  %v3222_v15 = vmov 0.0  }
 0x18c   : > { %1061 = vrot.lane.b32.xlu1 %v770_v12, %s3217_s13 }
 0x18d   : > { %1237 = vrot.lane.b32.xlu0 %v770_v12, %s3220_s17 }
 0x18e   : > { %v1164_v37 = vpop.permute.xlu1 %1163 }
 0x18f   : > { %v1106_v6 = vpop.permute.xlu0 %1105  ;;  %v1400_v38 = vsel %vm1389_vm11, %v1379_v59, %v1164_v37 }
 0x190   : > { %1121 = vrot.lane.b32.xlu1 %v578_v60, %s3218_s14 }
 0x191   : > { %1119 = vrot.lane.b32.xlu0 %v624_v45, %s3218_s14  ;;  %v1338_v45 = vsel %vm1326_vm8, %v1317_v23, %v4143_v17 }
 0x192   : > { %v988_v30 = vpop.permute.xlu1 %987  ;;  %v1359_v9 = vsel %vm1347_vm9, %v1338_v45, %v1046_v28 }
 0x193   : > { %v930_v26 = vpop.permute.xlu0 %929  ;;  %v1380_v16 = vsel %vm1368_vm10, %v1359_v9, %v1106_v6  ;;  %v1339_v7 = vsel %vm1326_vm8, %v1318_v24, %v988_v30  ;;  %v1298_v30 = vsel %vm1284_vm6, %v1277_v27, %v4175_v53  ;;  %v4266_v9 = vstv %s2931_s7 }
 0x194   : > { %1181 = vrot.lane.b32.xlu1 %v777_v11, %s3219_s29  ;;  %vm1677_vm14 = vcmp.ge.s32.totalorder %v4266_v9, 0  ;;  %vm1687_vm15 = vcmp.lt.s32.totalorder %v4266_v9, 16 }
 0x195   : > { %1179 = vrot.lane.b32.xlu0 %v775_v14, %s3219_s29  ;;  %vm1697_vm0 = vmand %vm1677_vm14, %vm1687_vm15 }
 0x196   : > { %v1224_v31 = vpop.permute.xlu1 %1223  ;;  %v2932_v24 = vsel %vm1697_vm0, 1.0, %v3222_v15 }
 0x197   : > { %v1421_v12 = vsel %vm1410_vm12, %v1400_v38, %v1224_v31  ;;  %v1166_v60 = vpop.permute.xlu0 %1165  ;;  %v4250_v31 = vld [vmem:[%s3984_s27 + $0x8] sm:$0xff] }
 0x198   : > { %1241 = vrot.lane.b32.xlu1 %v782_v32, %s3220_s17  ;;  %3036 = vmatprep.mubr.msk.f32.mxu0 %vm1436_vm13, %v1421_v12  ;;  %v1401_v50 = vsel %vm1389_vm11, %v1380_v16, %v1166_v60  ;;  %v433_v20 = vmul.f32 0.75, %v4250_v31 }
 0x199   : > { %1239 = vrot.lane.b32.xlu0 %v780_v0, %s3220_s17  ;;  %v1319_v0 = vsel %vm1305_vm7, %v1298_v30, %v930_v26  ;;  %v432_v26 = vmul.f32 0.75, %v4260_v48 }
 0x19a   : > { %v990_v41 = vpop.permute.xlu1 %989 }
 0x19b   : > { %v4213_v29 = vpop.permute.xlu0 %811  ;;  %v1340_v60 = vsel %vm1326_vm8, %v1319_v0, %v990_v41 }
 0x19e   : > { %v1226_v37 = vpop.permute.xlu1 %1225 }
 0x19f   : > { %v1422_v18 = vsel %vm1410_vm12, %v1401_v50, %v1226_v37  ;;  %v1048_v36 = vpop.permute.xlu0 %1047  ;;  %v453_v50 = vadd.f32 %v4018_v33, %v433_v20  ;;  %v1278_v20 = vsel %vm1263_vm5, %v3768_v57, %v4213_v29 }
 0x1a0   : > { %3037 = vmatmul.mubr.msk.f32.gmra.mxu0 %vm1436_vm13, %v1422_v18  ;;  %v1360_v59 = vsel %vm1347_vm9, %v1339_v7, %v1048_v36  ;;  %v452_v18 = vadd.f32 %v4021_v40, %v432_v26  ;;  %v4279_v36 = vstv %s403_s28 }
 0x1a2   : > { %v4220_v54 = vpop.permute.xlu1 %871  ;;  %v1749_v33 = vmul.f32 %v4030_v35, %v452_v18 }
 0x1a3   : > { %v4222_v52 = vpop.permute.xlu0 %813 }
 0x1a6   : > { %v1108_v8 = vpop.permute.xlu1 %1107 }
 0x1a7   : > { %v1050_v17 = vpop.permute.xlu0 %1049  ;;  %v1381_v32 = vsel %vm1368_vm10, %v1360_v59, %v1108_v8 }
 0x1a8   : > { %v1361_v44 = vsel %vm1347_vm9, %v1340_v60, %v1050_v17  ;;  %v1750_v17 = vmul.f32 %v4030_v35, %v453_v50 }
 0x1aa   : > { %v4224_v49 = vpop.permute.xlu1 %931 }
 0x1ab   : > { %v4226_v11 = vpop.permute.xlu0 %873 }
 0x1ae   : > { %v1168_v28 = vpop.permute.xlu1 %1167 }
 0x1af   : > { %v1110_v6 = vpop.permute.xlu0 %1109  ;;  %v1402_v38 = vsel %vm1389_vm11, %v1381_v32, %v1168_v28 }
 0x1b0   : > { %v1382_v53 = vsel %vm1368_vm10, %v1361_v44, %v1110_v6 }
 0x1b2   : > { %v4234_v14 = vpop.permute.xlu1 %991 }
 0x1b3   : > { %v4237_v4 = vpop.permute.xlu0 %933 }
 0x1b6   : > { %v1228_v42 = vpop.permute.xlu1 %1227 }
 0x1b7   : > { %v1423_v22 = vsel %vm1410_vm12, %v1402_v38, %v1228_v42  ;;  %v1170_v56 = vpop.permute.xlu0 %1169 }
 0x1b8   : > { %3039 = vmatprep.mubr.msk.f32.mxu0 %vm1436_vm13, %v1423_v22  ;;  %v1403_v23 = vsel %vm1389_vm11, %v1382_v53, %v1170_v56 }
 0x1ba   : > { %v4253_v12 = vpop.permute.xlu1 %993 }
 0x1bb   : > { %v4256_v5 = vpop.permute.xlu0 %815 }
 0x1be   : > { %v1230_v45 = vpop.permute.xlu1 %1229 }
 0x1bf   : > { %v1424_v41 = vsel %vm1410_vm12, %v1403_v23, %v1230_v45  ;;  %v1052_v16 = vpop.permute.xlu0 %1051  ;;  %v1299_v23 = vsel %vm1284_vm6, %v1278_v20, %v4220_v54 }
 0x1c0   : > { %3040 = vmatmul.mubr.msk.f32.gmra.mxu0 %vm1436_vm13, %v1424_v41  ;;  %v1320_v41 = vsel %vm1305_vm7, %v1299_v23, %v4224_v49 }
 0x1c1   : > { %v1341_v57 = vsel %vm1326_vm8, %v1320_v41, %v4234_v14 }
 0x1c2   : > { %v4276_v37 = vpop.permute.xlu1 %875 }
 0x1c3   : > { %v4281_v8 = vpop.permute.xlu0 %817 }
 0x1c5   : > { %v3023_v28 = vpop.f32.mrf.mxu0 }
 0x1c6   : > { %v1729_v6 = vmul.f32 %v3023_v28, %v4279_v36  ;;  %v1112_v13 = vpop.permute.xlu1 %1111 }
 0x1c7   : > { %v1567_v7 = vpop.f32.mrf.mxu0  ;;  %v1054_v59 = vpop.permute.xlu0 %1053 }
 0x1c8   : > { %v1770_v32 = vadd.f32 %v1750_v17, %v1729_v6  ;;  %v1728_v40 = vmul.f32 %v4279_v36, %v1567_v7 }
 0x1ca   : > { %v1790_v38 = vmul.f32 %v2932_v24, %v1770_v32  ;;  %v1769_v42 = vadd.f32 %v1749_v33, %v1728_v40  ;;  %v4288_v22 = vpop.permute.xlu1 %935 }
 0x1cb   : > { %v4290_v56 = vpop.permute.xlu0 %877 }
 0x1cc   : > { %v1830_v27 = vrot.slane %v1790_v38, 7  ;;  %v1789_v30 = vmul.f32 %v2932_v24, %v1769_v42  ;;  %v1362_v24 = vsel %vm1347_vm9, %v1341_v57, %v1052_v16  ;;  %v463_v38 = vmul.f32 0.25, %v4250_v31 }
 0x1cd   : > { %v1383_v14 = vsel %vm1368_vm10, %v1362_v24, %v1112_v13  ;;  %v4328_v16 = vmul.f32 0.75, %v4001_v19  ;;  %v1279_v13 = vsel %vm1263_vm5, %v3775_v62, %v4222_v52  ;;  %v1668_v31 = vadd.s32 1, %v4266_v9 }
 0x1ce   : > { %v1897_v0 = vsel %vm542_vm1, %v1830_v27, 0.0  ;;  %v1829_v60 = vrot.slane %v1789_v30, 7  ;;  %v1172_v44 = vpop.permute.xlu1 %1171  ;;  %v4341_v19 = vmul.f32 0.75, %v4004_v10 }
 0x1cf   : > { %v1114_v53 = vpop.permute.xlu0 %1113  ;;  %v1926_v18 = vrot.slane %v1897_v0, 1  ;;  %v1966_v7 = vrot.slane %v1897_v0, 2  ;;  %v1404_v32 = vsel %vm1389_vm11, %v1383_v14, %v1172_v44  ;;  %v1300_v0 = vsel %vm1284_vm6, %v1279_v13, %v4226_v11 }
 0x1d0   : > { %v4299_v45 = vsel %vm542_vm1, %v1829_v60, %v1830_v27  ;;  %v4302_v26 = vsel %vm542_vm1, 0.0, %v1829_v60  ;;  %v462_v44 = vmul.f32 0.25, %v4260_v48  ;;  %v1321_v20 = vsel %vm1305_vm7, %v1300_v0, %v4237_v4 }
 0x1d1   : > { %v1924_v50 = vrot.slane %v4299_v45, 1  ;;  %v1923_v17 = vrot.slane %v4302_v26, 1  ;;  %v1964_v33 = vrot.slane %v4299_v45, 2  ;;  %v1963_v49 = vrot.slane %v4302_v26, 2 }
 0x1d2   : > { %v4310_v29 = vpop.permute.xlu1 %995  ;;  %v1342_v52 = vsel %vm1326_vm8, %v1321_v20, %v4253_v12  ;;  %v483_v41 = vadd.f32 %v4328_v16, %v463_v38  ;;  %vm1678_vm14 = vcmp.ge.s32.totalorder %v1668_v31, 0  ;;  %vm1688_vm15 = vcmp.lt.s32.totalorder %v1668_v31, 16 }
 0x1d3   : > { %v4312_v54 = vpop.permute.xlu0 %937  ;;  %v1927_v28 = vsel %vm657_vm2, %v1924_v50, %v1926_v18  ;;  %v1925_v6 = vsel %vm657_vm2, %v1923_v17, %v1924_v50  ;;  %v1967_v30 = vsel %vm708_vm3, %v1964_v33, %v1966_v7  ;;  %v1965_v60 = vsel %vm708_vm3, %v1963_v49, %v1964_v33  ;;  %vm1698_vm0 = vmand %vm1678_vm14, %vm1688_vm15 }
 0x1d4   : > { %2029 = vrot.lane.b32.xlu1 %v1927_v28, %s3213_s9  ;;  %2027 = vrot.lane.b32.xlu0 %v1925_v6, %s3213_s9  ;;  %v1363_v11 = vsel %vm1347_vm9, %v1342_v52, %v1054_v59  ;;  %v482_v10 = vadd.f32 %v4341_v19, %v462_v44  ;;  %v1752_v12 = vmul.f32 %v4030_v35, %v483_v41 }
 0x1d5   : > { %v1384_v48 = vsel %vm1368_vm10, %v1363_v11, %v1114_v53  ;;  %v2933_v53 = vsel %vm1698_vm0, 1.0, %v3222_v15 }
 0x1d6   : > { %v1232_v40 = vpop.permute.xlu1 %1231  ;;  %v1751_v28 = vmul.f32 %v4030_v35, %v482_v10 }
 0x1d7   : > { %v1425_v42 = vsel %vm1410_vm12, %v1404_v32, %v1232_v40  ;;  %v1174_v27 = vpop.permute.xlu0 %1173 }
 0x1d8   : > { %2077 = vrot.lane.b32.xlu1 %v1967_v30, %s3214_s10  ;;  %2075 = vrot.lane.b32.xlu0 %v1965_v60, %s3214_s10  ;;  %v1405_v50 = vsel %vm1389_vm11, %v1384_v48, %v1174_v27 }
 0x1d9   : > { %3042 = vmatprep.mubr.msk.f32.mxu0 %vm1436_vm13, %v1425_v42 }
 0x1da   : > { %v4345_v62 = vpop.permute.xlu1 %997 }
 0x1db   : > { %v4349_v23 = vpop.permute.xlu0 %819 }
 0x1de   : > { %v1234_v4 = vpop.permute.xlu1 %1233 }
 0x1df   : > { %v1426_v18 = vsel %vm1410_vm12, %v1405_v50, %v1234_v4  ;;  %v1056_v17 = vpop.permute.xlu0 %1055  ;;  %v1280_v4 = vsel %vm1263_vm5, %v3849_v47, %v4256_v5 }
 0x1e0   : > { %v3026_v57 = vpop.f32.mrf.mxu0  ;;  %3043 = vmatmul.mubr.msk.f32.gmra.mxu0 %vm1436_vm13, %v1426_v18  ;;  %v1301_v18 = vsel %vm1284_vm6, %v1280_v4, %v4276_v37 }
 0x1e1   : > { %v1731_v59 = vmul.f32 %v3026_v57, %v4279_v36  ;;  %v1322_v57 = vsel %vm1305_vm7, %v1301_v18, %v4288_v22 }
 0x1e2   : > { %v4362_v6 = vpop.permute.xlu1 %879  ;;  %v1577_v33 = vpop.f32.mrf.mxu0 }
 0x1e3   : > { %v1772_v49 = vadd.f32 %v1752_v12, %v1731_v59  ;;  %v1730_v24 = vmul.f32 %v4279_v36, %v1577_v33  ;;  %v4365_v14 = vpop.permute.xlu0 %821 }
 0x1e5   : > { %v1792_v7 = vmul.f32 %v2933_v53, %v1772_v49  ;;  %v1771_v32 = vadd.f32 %v1751_v28, %v1730_v24  ;;  %v1343_v28 = vsel %vm1326_vm8, %v1322_v57, %v4310_v29  ;;  %v1669_v29 = vadd.s32 2, %v4266_v9 }
 0x1e6   : > { %v1116_v40 = vpop.permute.xlu1 %1115  ;;  %v1364_v5 = vsel %vm1347_vm9, %v1343_v28, %v1056_v17  ;;  %v1281_v17 = vsel %vm1263_vm5, %v3856_v63, %v4281_v8  ;;  %v455_v8 = vadd.f32 %v4328_v16, %v4023_v43  ;;  %v1282_v57 = vsel %vm1263_vm5, %v3930_v46, %v4349_v23 }
 0x1e7   : > { %v1791_v38 = vmul.f32 %v2933_v53, %v1771_v32  ;;  %v1058_v42 = vpop.permute.xlu0 %1057  ;;  %v1833_v27 = vrot.slane %v1792_v7, 7  ;;  %v1385_v37 = vsel %vm1368_vm10, %v1364_v5, %v1116_v40  ;;  %v1302_v32 = vsel %vm1284_vm6, %v1281_v17, %v4290_v56 }
 0x1e8   : > { %vm1679_vm14 = vcmp.ge.s32.totalorder %v1669_v29, 0  ;;  %vm1689_vm15 = vcmp.lt.s32.totalorder %v1669_v29, 16  ;;  %v1303_v5 = vsel %vm1284_vm6, %v1282_v57, %v4362_v6 }
 0x1e9   : > { %v1832_v30 = vrot.slane %v1791_v38, 7  ;;  %v1898_v52 = vsel %vm542_vm1, %v1833_v27, 0.0  ;;  %vm1699_vm0 = vmand %vm1679_vm14, %vm1689_vm15 }
 0x1ea   : > { %v4367_v60 = vpop.permute.xlu1 %939  ;;  %v1931_v12 = vrot.slane %v1898_v52, 1  ;;  %v1971_v38 = vrot.slane %v1898_v52, 2  ;;  %v2934_v43 = vsel %vm1699_vm0, 1.0, %v3222_v15 }
 0x1eb   : > { %v4369_v13 = vpop.permute.xlu0 %881  ;;  %v4372_v31 = vsel %vm542_vm1, %v1832_v30, %v1833_v27  ;;  %v4375_v0 = vsel %vm542_vm1, 0.0, %v1832_v30  ;;  %v1323_v27 = vsel %vm1305_vm7, %v1302_v32, %v4312_v54 }
 0x1ec   : > { %v1929_v44 = vrot.slane %v4372_v31, 1  ;;  %2125 = vrot.lane.b32.xlu1 %v4372_v31, %s3215_s11  ;;  %v1928_v20 = vrot.slane %v4375_v0, 1  ;;  %2123 = vrot.lane.b32.xlu0 %v4375_v0, %s3215_s11  ;;  %v1969_v48 = vrot.slane %v4372_v31, 2  ;;  %v1968_v10 = vrot.slane %v4375_v0, 2 }
 0x1ee   : > { %v1176_v41 = vpop.permute.xlu1 %1175  ;;  %v1930_v11 = vsel %vm657_vm2, %v1928_v20, %v1929_v44  ;;  %v1970_v33 = vsel %vm708_vm3, %v1968_v10, %v1969_v48  ;;  %v1932_v47 = vsel %vm657_vm2, %v1929_v44, %v1931_v12  ;;  %v1344_v44 = vsel %vm1326_vm8, %v1323_v27, %v4345_v62 }
 0x1ef   : > { %v1118_v50 = vpop.permute.xlu0 %1117  ;;  %v1406_v49 = vsel %vm1389_vm11, %v1385_v37, %v1176_v41  ;;  %v1972_v20 = vsel %vm708_vm3, %v1969_v48, %v1971_v38  ;;  %v1365_v63 = vsel %vm1347_vm9, %v1344_v44, %v1058_v42  ;;  %v454_v62 = vadd.f32 %v4341_v19, %v4036_v1 }
 0x1f0   : > { %2031 = vrot.lane.b32.xlu1 %v1930_v11, %s3213_s9  ;;  %2171 = vrot.lane.b32.xlu0 %v1930_v11, %s3216_s12  ;;  %v1386_v56 = vsel %vm1368_vm10, %v1365_v63, %v1118_v50  ;;  %v1754_v10 = vmul.f32 %v4030_v35, %v455_v8  ;;  %v1283_v12 = vsel %vm1263_vm5, %v3937_v39, %v4365_v14  ;;  %v2542_v8 = vld [vmem:[%s5112_s4 + $0x18] sm:$0xff] }
 0x1f1   : > { %v1753_v1 = vmul.f32 %v4030_v35, %v454_v62  ;;  %v1304_v28 = vsel %vm1284_vm6, %v1283_v12, %v4369_v13  ;;  %v2540_v62 = vld [vmem:[%s5112_s4 + $0x8] sm:$0xff] }
 0x1f2   : > { %v1000_v59 = vpop.permute.xlu1 %999 }
 0x1f3   : > { %v942_v53 = vpop.permute.xlu0 %941 }
 0x1f4   : > { %2219 = vrot.lane.b32.xlu1 %v1970_v33, %s3217_s13  ;;  %2173 = vrot.lane.b32.xlu0 %v1932_v47, %s3216_s12  ;;  %v1325_v37 = vsel %vm1305_vm7, %v1304_v28, %v942_v53 }
 0x1f6   : > { %v1236_v22 = vpop.permute.xlu1 %1235 }
 0x1f7   : > { %v1427_v24 = vsel %vm1410_vm12, %v1406_v49, %v1236_v22  ;;  %v1178_v7 = vpop.permute.xlu0 %1177  ;;  %v1324_v49 = vsel %vm1305_vm7, %v1303_v5, %v4367_v60 }
 0x1f8   : > { %3045 = vmatprep.mubr.msk.f32.mxu0 %vm1436_vm13, %v1427_v24  ;;  %2079 = vrot.lane.b32.xlu1 %v1970_v33, %s3214_s10  ;;  %v1407_v54 = vsel %vm1389_vm11, %v1386_v56, %v1178_v7  ;;  %v1345_v46 = vsel %vm1326_vm8, %v1324_v49, %v1000_v59 }
 0x1f9   : > { %2033 = vrot.lane.b32.xlu0 %v1932_v47, %s3213_s9 }
 0x1fa   : > { %v1060_v40 = vpop.permute.xlu1 %1059 }
 0x1fb   : > { %v1002_v30 = vpop.permute.xlu0 %1001  ;;  %v1366_v13 = vsel %vm1347_vm9, %v1345_v46, %v1060_v40 }
 0x1fc   : > { %v1346_v39 = vsel %vm1326_vm8, %v1325_v37, %v1002_v30  ;;  %v2543_v30 = vld [vmem:[%s5112_s4 + $0x20] sm:$0xf] }
 0x1fd   : > { %2221 = vrot.lane.b32.xlu0 %v1972_v20, %s3217_s13  ;;  %3051 = vmatprep.subr.msk.mxu1 %vm1497_vm4, %v2543_v30 }
 0x1fe   : > { %v1062_v52 = vpop.permute.xlu1 %1061  ;;  %3052 = vmatpush3.msk.msra.mxu1 %vm1497_vm4, %v2543_v30 }
 0x1ff   : > { %v1238_v41 = vpop.permute.xlu0 %1237  ;;  %v1367_v23 = vsel %vm1347_vm9, %v1346_v39, %v1062_v52  ;;  %3053 = vmatprep.subr.mxu1 %v2542_v8  ;;  %v2541_v52 = vld [vmem:[%s5112_s4 + $0x10] sm:$0xff] }
 0x200   : > { %v1428_v11 = vsel %vm1410_vm12, %v1407_v54, %v1238_v41  ;;  %v3029_v48 = vpop.f32.mrf.mxu0  ;;  %3054 = vmatpush3.msra.mxu1 %v2542_v8 }
 0x201   : > { %v1733_v42 = vmul.f32 %v3029_v48, %v4279_v36  ;;  %3046 = vmatmul.mubr.msk.f32.gmra.mxu0 %vm1436_vm13, %v1428_v11  ;;  %2081 = vrot.lane.b32.xlu0 %v1972_v20, %s3214_s10  ;;  %v2539_v11 = vld [vmem:[%s5112_s4] sm:$0xff] }
 0x202   : > { %v1122_v16 = vpop.permute.xlu1 %1121  ;;  %v1587_v50 = vpop.f32.mrf.mxu0  ;;  %3055 = vmatprep.subr.mxu1 %v2541_v52 }
 0x203   : > { %v1774_v4 = vadd.f32 %v1754_v10, %v1733_v42  ;;  %v1732_v18 = vmul.f32 %v4279_v36, %v1587_v50  ;;  %v1120_v19 = vpop.permute.xlu0 %1119  ;;  %v1388_v7 = vsel %vm1368_vm10, %v1367_v23, %v1122_v16  ;;  %3056 = vmatpush3.msra.mxu1 %v2541_v52  ;;  %v1670_v10 = vadd.s32 3, %v4266_v9  ;;  %v5124_v52 = vld [vmem:[#allocation9_spill] sm:$0xff] }
 0x204   : > { %v1387_v53 = vsel %vm1368_vm10, %v1366_v13, %v1120_v19  ;;  %3057 = vmatprep.subr.mxu1 %v2540_v62  ;;  %v5121_v19 = vld [vmem:[#allocation6_spill] sm:$0xff] }
 0x205   : > { %v1794_v33 = vmul.f32 %v2934_v43, %v1774_v4  ;;  %v1773_v47 = vadd.f32 %v1753_v1, %v1732_v18  ;;  %3058 = vmatpush3.msra.mxu1 %v2540_v62  ;;  %vm1680_vm4 = vcmp.ge.s32.totalorder %v1670_v10, 0  ;;  %vm1690_vm14 = vcmp.lt.s32.totalorder %v1670_v10, 16 }
 0x206   : > { %v1182_v35 = vpop.permute.xlu1 %1181  ;;  %3059 = vmatprep.subr.mxu1 %v2539_v11  ;;  %vm1700_vm15 = vmand %vm1680_vm4, %vm1690_vm14 }
 0x207   : > { %v1793_v14 = vmul.f32 %v2934_v43, %v1773_v47  ;;  %v1180_v22 = vpop.permute.xlu0 %1179  ;;  %v1836_v24 = vrot.slane %v1794_v33, 7  ;;  %v1409_v29 = vsel %vm1389_vm11, %v1388_v7, %v1182_v35  ;;  %3060 = vmatpush3.msra.mxu1 %v2539_v11  ;;  %v2935_v18 = vsel %vm1700_vm15, 1.0, %v3222_v15  ;;  %v5122_v47 = vld [vmem:[#allocation7_spill] sm:$0xff] }
 0x208   : > { %v1408_v60 = vsel %vm1389_vm11, %v1387_v53, %v1180_v22 }
 0x209   : > { %v1835_v6 = vrot.slane %v1793_v14, 7  ;;  %v1899_v44 = vsel %vm542_vm1, %v1836_v24, 0.0 }
 0x20a   : > { %v1242_v17 = vpop.permute.xlu1 %1241  ;;  %v1936_v56 = vrot.slane %v1899_v44, 1  ;;  %v1976_v4 = vrot.slane %v1899_v44, 2  ;;  %v5123_v44 = vld [vmem:[#allocation8_spill] sm:$0xff] }
 0x20b   : > { %v1430_v32 = vsel %vm1410_vm12, %v1409_v29, %v1242_v17  ;;  %v1240_v38 = vpop.permute.xlu0 %1239  ;;  %v4459_v59 = vsel %vm542_vm1, 0.0, %v1835_v6  ;;  %v4462_v27 = vsel %vm542_vm1, %v1835_v6, %v1836_v24  ;;  %v1671_v29 = vadd.s32 4, %v4266_v9 }
 0x20c   : > { %v1429_v40 = vsel %vm1410_vm12, %v1408_v60, %v1240_v38  ;;  %2267 = vrot.lane.b32.xlu1 %v4459_v59, %s3218_s14  ;;  %2269 = vrot.lane.b32.xlu0 %v4462_v27, %s3218_s14  ;;  %v1933_v20 = vrot.slane %v4459_v59, 1  ;;  %v1934_v63 = vrot.slane %v4462_v27, 1  ;;  %v1973_v48 = vrot.slane %v4459_v59, 2 }
 0x20d   : > { %3048 = vmatprep.mubr.msk.f32.mxu0 %vm1436_vm13, %v1429_v40  ;;  %v1974_v42 = vrot.slane %v4462_v27, 2  ;;  %vm1681_vm0 = vcmp.ge.s32.totalorder %v1671_v29, 0  ;;  %vm1691_vm4 = vcmp.lt.s32.totalorder %v1671_v29, 16 }
 0x20e   : > { %3049 = vmatmul.mubr.msk.f32.gmra.mxu0 %vm1436_vm13, %v1430_v32  ;;  %v1935_v54 = vsel %vm657_vm2, %v1933_v20, %v1934_v63  ;;  %v1937_v41 = vsel %vm657_vm2, %v1934_v63, %v1936_v56  ;;  %vm1701_vm14 = vmand %vm1681_vm0, %vm1691_vm4 }
 0x20f   : > { %v1975_v43 = vsel %vm708_vm3, %v1973_v48, %v1974_v42  ;;  %v1977_v28 = vsel %vm708_vm3, %v1974_v42, %v1976_v4  ;;  %v2936_v40 = vsel %vm1701_vm14, 1.0, %v3222_v15 }
 0x210   : > { %2127 = vrot.lane.b32.xlu1 %v4459_v59, %s3215_s11  ;;  %2129 = vrot.lane.b32.xlu0 %v4462_v27, %s3215_s11 }
 0x214   : > { %2315 = vrot.lane.b32.xlu1 %v1935_v54, %s3219_s29  ;;  %2317 = vrot.lane.b32.xlu0 %v1937_v41, %s3219_s29 }
 0x218   : > { %2175 = vrot.lane.b32.xlu1 %v1935_v54, %s3216_s12  ;;  %2035 = vrot.lane.b32.xlu0 %v1935_v54, %s3213_s9 }
 0x21c   : > { %2363 = vrot.lane.b32.xlu1 %v1975_v43, %s3220_s17  ;;  %2223 = vrot.lane.b32.xlu0 %v1975_v43, %s3217_s13 }
 0x220   : > { %v3032_v16 = vpop.f32.mrf.mxu0  ;;  %2177 = vrot.lane.b32.xlu1 %v1937_v41, %s3216_s12  ;;  %2037 = vrot.lane.b32.xlu0 %v1937_v41, %s3213_s9 }
 0x221   : > { %v1735_v50 = vmul.f32 %v3032_v16, %v4279_v36 }
 0x222   : > { %v1597_v1 = vpop.f32.mrf.mxu0 }
 0x223   : > { %v1776_v12 = vadd.f32 %v5121_v19, %v1735_v50  ;;  %v1734_v57 = vmul.f32 %v4279_v36, %v1597_v1 }
 0x224   : > { %2365 = vrot.lane.b32.xlu1 %v1977_v28, %s3220_s17  ;;  %2225 = vrot.lane.b32.xlu0 %v1977_v28, %s3217_s13 }
 0x225   : > { %v1796_v33 = vmul.f32 %v2935_v18, %v1776_v12  ;;  %v1775_v5 = vadd.f32 %v5122_v47, %v1734_v57  ;;  %v1672_v57 = vadd.s32 5, %v4266_v9 }
 0x227   : > { %v1795_v37 = vmul.f32 %v2935_v18, %v1775_v5  ;;  %v1839_v35 = vrot.slane %v1796_v33, 7  ;;  %vm1682_vm15 = vcmp.ge.s32.totalorder %v1672_v57, 0  ;;  %vm1692_vm0 = vcmp.lt.s32.totalorder %v1672_v57, 16 }
 0x228   : > { %2083 = vrot.lane.b32.xlu1 %v1975_v43, %s3214_s10  ;;  %2085 = vrot.lane.b32.xlu0 %v1977_v28, %s3214_s10  ;;  %vm1702_vm4 = vmand %vm1682_vm15, %vm1692_vm0 }
 0x229   : > { %v1838_v49 = vrot.slane %v1795_v37, 7  ;;  %v1900_v22 = vsel %vm542_vm1, %v1839_v35, 0.0 }
 0x22a   : > { %v1941_v13 = vrot.slane %v1900_v22, 1  ;;  %v1981_v38 = vrot.slane %v1900_v22, 2  ;;  %v2937_v22 = vsel %vm1702_vm4, 1.0, %v3222_v15 }
 0x22b   : > { %v4520_v39 = vsel %vm542_vm1, 0.0, %v1838_v49  ;;  %v4523_v14 = vsel %vm542_vm1, %v1838_v49, %v1839_v35 }
 0x22c   : > { %2271 = vrot.lane.b32.xlu1 %v4520_v39, %s3218_s14  ;;  %2273 = vrot.lane.b32.xlu0 %v4523_v14, %s3218_s14  ;;  %v1938_v46 = vrot.slane %v4520_v39, 1  ;;  %v1939_v23 = vrot.slane %v4523_v14, 1  ;;  %v1978_v6 = vrot.slane %v4520_v39, 2  ;;  %v1979_v53 = vrot.slane %v4523_v14, 2 }
 0x22e   : > { %v1940_v24 = vsel %vm657_vm2, %v1938_v46, %v1939_v23  ;;  %v1942_v7 = vsel %vm657_vm2, %v1939_v23, %v1941_v13  ;;  %v1980_v17 = vsel %vm708_vm3, %v1978_v6, %v1979_v53  ;;  %v1982_v8 = vsel %vm708_vm3, %v1979_v53, %v1981_v38  ;;  %v5125_v23 = vld [vmem:[#allocation10_spill] sm:$0xff] }
 0x230   : > { %2131 = vrot.lane.b32.xlu1 %v4520_v39, %s3215_s11  ;;  %2133 = vrot.lane.b32.xlu0 %v4523_v14, %s3215_s11 }
 0x234   : > { %2319 = vrot.lane.b32.xlu1 %v1940_v24, %s3219_s29  ;;  %2321 = vrot.lane.b32.xlu0 %v1942_v7, %s3219_s29 }
 0x238   : > { %2179 = vrot.lane.b32.xlu1 %v1940_v24, %s3216_s12  ;;  %2039 = vrot.lane.b32.xlu0 %v1940_v24, %s3213_s9 }
 0x23c   : > { %2367 = vrot.lane.b32.xlu1 %v1980_v17, %s3220_s17  ;;  %2227 = vrot.lane.b32.xlu0 %v1980_v17, %s3217_s13 }
 0x240   : > { %v3035_v60 = vpop.f32.mrf.mxu0  ;;  %2181 = vrot.lane.b32.xlu1 %v1942_v7, %s3216_s12  ;;  %2041 = vrot.lane.b32.xlu0 %v1942_v7, %s3213_s9 }
 0x241   : > { %v1737_v32 = vmul.f32 %v3035_v60, %v4279_v36 }
 0x242   : > { %v1607_v30 = vpop.f32.mrf.mxu0 }
 0x243   : > { %v1778_v20 = vadd.f32 %v5123_v44, %v1737_v32  ;;  %v1736_v63 = vmul.f32 %v4279_v36, %v1607_v30 }
 0x244   : > { %2369 = vrot.lane.b32.xlu1 %v1982_v8, %s3220_s17  ;;  %2229 = vrot.lane.b32.xlu0 %v1982_v8, %s3217_s13 }
 0x245   : > { %v1798_v56 = vmul.f32 %v2936_v40, %v1778_v20  ;;  %v1777_v54 = vadd.f32 %v5124_v52, %v1736_v63 }
 0x246   : > { %v4579_v1 = vpop.permute.xlu0 %2027  ;;  %v4593_v47 = vpop.permute.xlu1 %2029 }
 0x247   : > { %v1797_v41 = vmul.f32 %v2936_v40, %v1777_v54  ;;  %v1842_v62 = vrot.slane %v1798_v56, 7 }
 0x248   : > { %2087 = vrot.lane.b32.xlu1 %v1980_v17, %s3214_s10  ;;  %2089 = vrot.lane.b32.xlu0 %v1982_v8, %s3214_s10 }
 0x249   : > { %v1841_v11 = vrot.slane %v1797_v41, 7  ;;  %v1901_v10 = vsel %vm542_vm1, %v1842_v62, 0.0 }
 0x24a   : > { %v1946_v50 = vrot.slane %v1901_v10, 1  ;;  %v4588_v28 = vpop.permute.xlu0 %2075  ;;  %v1986_v49 = vrot.slane %v1901_v10, 2  ;;  %v4606_v53 = vpop.permute.xlu1 %2077 }
 0x24b   : > { %v4561_v48 = vsel %vm542_vm1, 0.0, %v1841_v11  ;;  %v4564_v42 = vsel %vm542_vm1, %v1841_v11, %v1842_v62 }
 0x24c   : > { %2275 = vrot.lane.b32.xlu1 %v4561_v48, %s3218_s14  ;;  %2277 = vrot.lane.b32.xlu0 %v4564_v42, %s3218_s14  ;;  %v1943_v43 = vrot.slane %v4561_v48, 1  ;;  %v1944_v16 = vrot.slane %v4564_v42, 1  ;;  %v1983_v19 = vrot.slane %v4561_v48, 2  ;;  %v1984_v12 = vrot.slane %v4564_v42, 2 }
 0x24e   : > { %v1945_v4 = vsel %vm657_vm2, %v1943_v43, %v1944_v16  ;;  %v1947_v18 = vsel %vm657_vm2, %v1944_v16, %v1946_v50  ;;  %v1985_v33 = vsel %vm708_vm3, %v1983_v19, %v1984_v12  ;;  %v1987_v6 = vsel %vm708_vm3, %v1984_v12, %v1986_v49 }
 0x24f   : > { %v1673_v50 = vadd.s32 6, %v4266_v9 }
 0x250   : > { %2135 = vrot.lane.b32.xlu1 %v4561_v48, %s3215_s11  ;;  %2137 = vrot.lane.b32.xlu0 %v4564_v42, %s3215_s11 }
 0x251   : > { %vm1683_vm14 = vcmp.ge.s32.totalorder %v1673_v50, 0  ;;  %vm1693_vm15 = vcmp.lt.s32.totalorder %v1673_v50, 16 }
 0x252   : > { %vm1703_vm0 = vmand %vm1683_vm14, %vm1693_vm15 }
 0x253   : > { %v2938_v49 = vsel %vm1703_vm0, 1.0, %v3222_v15 }
 0x254   : > { %2323 = vrot.lane.b32.xlu1 %v1945_v4, %s3219_s29  ;;  %2325 = vrot.lane.b32.xlu0 %v1947_v18, %s3219_s29 }
 0x258   : > { %2183 = vrot.lane.b32.xlu1 %v1945_v4, %s3216_s12  ;;  %2043 = vrot.lane.b32.xlu0 %v1945_v4, %s3213_s9 }
 0x25c   : > { %2371 = vrot.lane.b32.xlu1 %v1985_v33, %s3220_s17  ;;  %2231 = vrot.lane.b32.xlu0 %v1985_v33, %s3217_s13 }
 0x25e   : > { %v4595_v5 = vpop.permute.xlu0 %2123  ;;  %v4611_v32 = vpop.permute.xlu1 %2125 }
 0x260   : > { %v3038_v37 = vpop.f32.mrf.mxu0  ;;  %2185 = vrot.lane.b32.xlu1 %v1947_v18, %s3216_s12  ;;  %2045 = vrot.lane.b32.xlu0 %v1947_v18, %s3213_s9 }
 0x261   : > { %v1739_v35 = vmul.f32 %v3038_v37, %v4279_v36 }
 0x262   : > { %v1617_v46 = vpop.f32.mrf.mxu0  ;;  %v4603_v7 = vpop.permute.xlu0 %2171 }
 0x263   : > { %v1780_v13 = vadd.f32 %v5125_v23, %v1739_v35  ;;  %v1738_v24 = vmul.f32 %v4279_v36, %v1617_v46  ;;  %v4628_v63 = vpop.permute.xlu1 %2031 }
 0x264   : > { %2373 = vrot.lane.b32.xlu1 %v1987_v6, %s3220_s17  ;;  %2233 = vrot.lane.b32.xlu0 %v1987_v6, %s3217_s13 }
 0x265   : > { %v1800_v29 = vmul.f32 %v2937_v22, %v1780_v13  ;;  %v1779_v17 = vadd.f32 %v4077_v25, %v1738_v24 }
 0x266   : > { %v4613_v38 = vpop.permute.xlu0 %2173 }
 0x267   : > { %v1799_v60 = vmul.f32 %v2937_v22, %v1779_v17  ;;  %v1845_v40 = vrot.slane %v1800_v29, 7  ;;  %v2220_v11 = vpop.permute.xlu1 %2219 }
 0x268   : > { %2091 = vrot.lane.b32.xlu1 %v1985_v33, %s3214_s10  ;;  %2093 = vrot.lane.b32.xlu0 %v1987_v6, %s3214_s10 }
 0x269   : > { %v1844_v30 = vrot.slane %v1799_v60, 7  ;;  %v1902_v25 = vsel %vm542_vm1, %v1845_v40, 0.0 }
 0x26a   : > { %v1951_v54 = vrot.slane %v1902_v25, 1  ;;  %v1991_v35 = vrot.slane %v1902_v25, 2 }
 0x26b   : > { %v4618_v44 = vsel %vm542_vm1, 0.0, %v1844_v30  ;;  %v4621_v20 = vsel %vm542_vm1, %v1844_v30, %v1845_v40  ;;  %v4630_v8 = vpop.permute.xlu0 %2033  ;;  %v4649_v4 = vpop.permute.xlu1 %2079 }
 0x26c   : > { %2279 = vrot.lane.b32.xlu1 %v4618_v44, %s3218_s14  ;;  %2281 = vrot.lane.b32.xlu0 %v4621_v20, %s3218_s14  ;;  %v1948_v56 = vrot.slane %v4618_v44, 1  ;;  %v1949_v52 = vrot.slane %v4621_v20, 1  ;;  %v1988_v43 = vrot.slane %v4618_v44, 2  ;;  %v1989_v16 = vrot.slane %v4621_v20, 2 }
 0x26e   : > { %v1950_v41 = vsel %vm657_vm2, %v1948_v56, %v1949_v52  ;;  %v1952_v62 = vsel %vm657_vm2, %v1949_v52, %v1951_v54  ;;  %v1990_v19 = vsel %vm708_vm3, %v1988_v43, %v1989_v16  ;;  %v1992_v6 = vsel %vm708_vm3, %v1989_v16, %v1991_v35 }
 0x26f   : > { %v4640_v10 = vpop.permute.xlu0 %2221 }
 0x270   : > { %2139 = vrot.lane.b32.xlu1 %v4618_v44, %s3215_s11  ;;  %2141 = vrot.lane.b32.xlu0 %v4621_v20, %s3215_s11 }
 0x273   : > { %v4651_v18 = vpop.permute.xlu0 %2081 }
 0x274   : > { %2327 = vrot.lane.b32.xlu1 %v1950_v41, %s3219_s29  ;;  %2329 = vrot.lane.b32.xlu0 %v1952_v62, %s3219_s29 }
 0x278   : > { %2187 = vrot.lane.b32.xlu1 %v1950_v41, %s3216_s12  ;;  %2047 = vrot.lane.b32.xlu0 %v1950_v41, %s3213_s9 }
 0x27c   : > { %2375 = vrot.lane.b32.xlu1 %v1990_v19, %s3220_s17  ;;  %2235 = vrot.lane.b32.xlu0 %v1990_v19, %s3217_s13 }
 0x27e   : > { %v2268_v12 = vpop.permute.xlu1 %2267  ;;  %v2270_v57 = vpop.permute.xlu0 %2269 }
 0x280   : > { %v3041_v33 = vpop.f32.mrf.mxu0  ;;  %2189 = vrot.lane.b32.xlu1 %v1952_v62, %s3216_s12  ;;  %2049 = vrot.lane.b32.xlu0 %v1952_v62, %s3213_s9 }
 0x281   : > { %v1741_v37 = vmul.f32 %v3041_v33, %v4279_v36 }
 0x282   : > { %v1627_v22 = vpop.f32.mrf.mxu0  ;;  %v4660_v46 = vpop.permute.xlu1 %2127 }
 0x283   : > { %v1782_v23 = vadd.f32 %v4081_v58, %v1741_v37  ;;  %v1740_v13 = vmul.f32 %v4279_v36, %v1627_v22  ;;  %v4664_v24 = vpop.permute.xlu0 %2129  ;;  %v2411_v58 = vsel %vm1263_vm5, %v4302_v26, %v4579_v1  ;;  %v2412_v37 = vsel %vm1263_vm5, %v4299_v45, %v4593_v47 }
 0x284   : > { %2377 = vrot.lane.b32.xlu1 %v1992_v6, %s3220_s17  ;;  %2237 = vrot.lane.b32.xlu0 %v1992_v6, %s3217_s13  ;;  %v2427_v25 = vsel %vm1284_vm6, %v2411_v58, %v4588_v28 }
 0x285   : > { %v1802_v29 = vmul.f32 %v2938_v49, %v1782_v23  ;;  %v1781_v17 = vadd.f32 %v4084_v3, %v1740_v13  ;;  %v2443_v54 = vsel %vm1305_vm7, %v2427_v25, %v4595_v5 }
 0x286   : > { %v2316_v60 = vpop.permute.xlu1 %2315  ;;  %v2459_v41 = vsel %vm1326_vm8, %v2443_v54, %v4603_v7 }
 0x287   : > { %v1801_v40 = vmul.f32 %v2938_v49, %v1781_v17  ;;  %v2318_v30 = vpop.permute.xlu0 %2317  ;;  %v1848_v56 = vrot.slane %v1802_v29, 7  ;;  %v2475_v28 = vsel %vm1347_vm9, %v2459_v41, %v2220_v11 }
 0x288   : > { %2095 = vrot.lane.b32.xlu1 %v1990_v19, %s3214_s10  ;;  %2097 = vrot.lane.b32.xlu0 %v1992_v6, %s3214_s10  ;;  %v2491_v5 = vsel %vm1368_vm10, %v2475_v28, %v2268_v12  ;;  %v2428_v12 = vsel %vm1284_vm6, %v2412_v37, %v4606_v53 }
 0x289   : > { %v1847_v52 = vrot.slane %v1801_v40, 7  ;;  %v1903_v7 = vsel %vm542_vm1, %v1848_v56, 0.0  ;;  %v2507_v43 = vsel %vm1389_vm11, %v2491_v5, %v2316_v60  ;;  %v2444_v49 = vsel %vm1305_vm7, %v2428_v12, %v4611_v32 }
 0x28a   : > { %v4679_v3 = vpop.permute.xlu1 %2175  ;;  %v1956_v35 = vrot.slane %v1903_v7, 1  ;;  %v2460_v45 = vsel %vm1326_vm8, %v2444_v49, %v4613_v38  ;;  %v1996_v41 = vrot.slane %v1903_v7, 2 }
 0x28b   : > { %v4683_v62 = vpop.permute.xlu0 %2035  ;;  %v4686_v26 = vsel %vm542_vm1, 0.0, %v1847_v52  ;;  %v4689_v1 = vsel %vm542_vm1, %v1847_v52, %v1848_v56  ;;  %v2476_v53 = vsel %vm1347_vm9, %v2460_v45, %v4640_v10  ;;  %v1674_v10 = vadd.s32 7, %v4266_v9 }
 0x28c   : > { %2283 = vrot.lane.b32.xlu1 %v4686_v26, %s3218_s14  ;;  %2285 = vrot.lane.b32.xlu0 %v4689_v1, %s3218_s14  ;;  %v1953_v33 = vrot.slane %v4686_v26, 1  ;;  %v1954_v11 = vrot.slane %v4689_v1, 1  ;;  %v2492_v32 = vsel %vm1368_vm10, %v2476_v53, %v2270_v57  ;;  %v1993_v60 = vrot.slane %v4686_v26, 2 }
 0x28d   : > { %v2508_v6 = vsel %vm1389_vm11, %v2492_v32, %v2318_v30  ;;  %v1994_v40 = vrot.slane %v4689_v1, 2  ;;  %vm1684_vm4 = vcmp.ge.s32.totalorder %v1674_v10, 0  ;;  %vm1694_vm14 = vcmp.lt.s32.totalorder %v1674_v10, 16 }
 0x28e   : > { %v2364_v16 = vpop.permute.xlu1 %2363  ;;  %v1955_v23 = vsel %vm657_vm2, %v1953_v33, %v1954_v11  ;;  %v1957_v13 = vsel %vm657_vm2, %v1954_v11, %v1956_v35  ;;  %vm1704_vm15 = vmand %vm1684_vm4, %vm1694_vm14 }
 0x28f   : > { %v4699_v50 = vpop.permute.xlu0 %2223  ;;  %v2523_v19 = vsel %vm1410_vm12, %v2507_v43, %v2364_v16  ;;  %v1995_v58 = vsel %vm708_vm3, %v1993_v60, %v1994_v40  ;;  %v2939_v28 = vsel %vm1704_vm15, 1.0, %v3222_v15  ;;  %v1997_v11 = vsel %vm708_vm3, %v1994_v40, %v1996_v41 }
 0x290   : > { %2143 = vrot.lane.b32.xlu1 %v4686_v26, %s3215_s11  ;;  %2145 = vrot.lane.b32.xlu0 %v4689_v1, %s3215_s11 }
 0x291   : > { %3061 = vmatprep.mubr.msk.f32.mxu1 %vm1436_vm13, %v2523_v19 }
 0x292   : > { %v4716_v22 = vpop.permute.xlu1 %2177 }
 0x293   : > { %v4720_v47 = vpop.permute.xlu0 %2037 }
 0x294   : > { %2331 = vrot.lane.b32.xlu1 %v1955_v23, %s3219_s29  ;;  %2333 = vrot.lane.b32.xlu0 %v1957_v13, %s3219_s29 }
 0x296   : > { %v2366_v29 = vpop.permute.xlu1 %2365 }
 0x297   : > { %v2524_v38 = vsel %vm1410_vm12, %v2508_v6, %v2366_v29  ;;  %v4731_v17 = vpop.permute.xlu0 %2225 }
 0x298   : > { %2191 = vrot.lane.b32.xlu1 %v1955_v23, %s3216_s12  ;;  %2051 = vrot.lane.b32.xlu0 %v1955_v23, %s3213_s9 }
 0x299   : > { %3062 = vmatmul.mubr.msk.f32.vlgmr.msra.gmra.mxu1 %vm1436_vm13, %v2524_v38 }
 0x29a   : > { %v4739_v57 = vpop.permute.xlu1 %2083 }
 0x29b   : > { %v4741_v30 = vpop.permute.xlu0 %2085 }
 0x29c   : > { %2379 = vrot.lane.b32.xlu1 %v1995_v58, %s3220_s17  ;;  %2239 = vrot.lane.b32.xlu0 %v1995_v58, %s3217_s13 }
 0x29e   : > { %v2272_v25 = vpop.permute.xlu1 %2271 }
 0x29f   : > { %v2274_v56 = vpop.permute.xlu0 %2273 }
 0x2a0   : > { %v3044_v52 = vpop.f32.mrf.mxu0  ;;  %2193 = vrot.lane.b32.xlu1 %v1957_v13, %s3216_s12  ;;  %2053 = vrot.lane.b32.xlu0 %v1957_v13, %s3213_s9 }
 0x2a1   : > { %v1743_v54 = vmul.f32 %v3044_v52, %v4279_v36 }
 0x2a2   : > { %v1637_v5 = vpop.f32.mrf.mxu0  ;;  %v4750_v43 = vpop.permute.xlu1 %2131 }
 0x2a3   : > { %v1784_v16 = vadd.f32 %v4092_v55, %v1743_v54  ;;  %v1742_v19 = vmul.f32 %v4279_v36, %v1637_v5  ;;  %v4754_v33 = vpop.permute.xlu0 %2133  ;;  %v2413_v55 = vsel %vm1263_vm5, %v4375_v0, %v4628_v63 }
 0x2a4   : > { %2381 = vrot.lane.b32.xlu1 %v1997_v11, %s3220_s17  ;;  %2241 = vrot.lane.b32.xlu0 %v1997_v11, %s3217_s13  ;;  %v2429_v45 = vsel %vm1284_vm6, %v2413_v55, %v4649_v4 }
 0x2a5   : > { %v1804_v37 = vmul.f32 %v2939_v28, %v1784_v16  ;;  %v1783_v7 = vadd.f32 %v4095_v61, %v1742_v19  ;;  %v2445_v53 = vsel %vm1305_vm7, %v2429_v45, %v4660_v46 }
 0x2a6   : > { %v2320_v12 = vpop.permute.xlu1 %2319  ;;  %v2461_v32 = vsel %vm1326_vm8, %v2445_v53, %v4679_v3 }
 0x2a7   : > { %v1803_v35 = vmul.f32 %v2939_v28, %v1783_v7  ;;  %v2322_v49 = vpop.permute.xlu0 %2321  ;;  %v1851_v23 = vrot.slane %v1804_v37, 7  ;;  %v2477_v4 = vsel %vm1347_vm9, %v2461_v32, %v4699_v50 }
 0x2a8   : > { %2099 = vrot.lane.b32.xlu1 %v1995_v58, %s3214_s10  ;;  %2101 = vrot.lane.b32.xlu0 %v1997_v11, %s3214_s10  ;;  %v2493_v46 = vsel %vm1368_vm10, %v2477_v4, %v2272_v25  ;;  %v2414_v58 = vsel %vm1263_vm5, %v4372_v31, %v4630_v8 }
 0x2a9   : > { %v1850_v13 = vrot.slane %v1803_v35, 7  ;;  %v1904_v3 = vsel %vm542_vm1, %v1851_v23, 0.0  ;;  %v2509_v29 = vsel %vm1389_vm11, %v2493_v46, %v2320_v12  ;;  %v2430_v25 = vsel %vm1284_vm6, %v2414_v58, %v4651_v18 }
 0x2aa   : > { %v4769_v61 = vpop.permute.xlu1 %2179  ;;  %v1961_v52 = vrot.slane %v1904_v3, 1  ;;  %v2446_v54 = vsel %vm1305_vm7, %v2430_v25, %v4664_v24  ;;  %v2415_v25 = vsel %vm1263_vm5, %v4459_v59, %v4683_v62 }
 0x2ab   : > { %v4773_v6 = vpop.permute.xlu0 %2039  ;;  %v4776_v0 = vsel %vm542_vm1, 0.0, %v1850_v13  ;;  %v4779_v63 = vsel %vm542_vm1, %v1850_v13, %v1851_v23  ;;  %v2462_v31 = vsel %vm1326_vm8, %v2446_v54, %v4716_v22  ;;  %v2001_v23 = vrot.slane %v1904_v3, 2 }
 0x2ac   : > { %2287 = vrot.lane.b32.xlu1 %v4776_v0, %s3218_s14  ;;  %2289 = vrot.lane.b32.xlu0 %v4779_v63, %s3218_s14  ;;  %v1958_v10 = vrot.slane %v4776_v0, 1  ;;  %v1959_v50 = vrot.slane %v4779_v63, 1  ;;  %v2478_v18 = vsel %vm1347_vm9, %v2462_v31, %v4731_v17  ;;  %v1998_v37 = vrot.slane %v4776_v0, 2 }
 0x2ad   : > { %v2494_v24 = vsel %vm1368_vm10, %v2478_v18, %v2274_v56  ;;  %v1999_v7 = vrot.slane %v4779_v63, 2  ;;  %v1675_v17 = vadd.s32 8, %v4266_v9  ;;  %v1676_v3 = vadd.s32 9, %v4266_v9 }
 0x2ae   : > { %v2368_v38 = vpop.permute.xlu1 %2367  ;;  %v1960_v28 = vsel %vm657_vm2, %v1958_v10, %v1959_v50  ;;  %v1962_v5 = vsel %vm657_vm2, %v1959_v50, %v1961_v52  ;;  %v2510_v16 = vsel %vm1389_vm11, %v2494_v24, %v2322_v49 }
 0x2af   : > { %v2525_v60 = vsel %vm1410_vm12, %v2509_v29, %v2368_v38  ;;  %v4791_v40 = vpop.permute.xlu0 %2227  ;;  %v2000_v35 = vsel %vm708_vm3, %v1998_v37, %v1999_v7  ;;  %vm1685_vm0 = vcmp.ge.s32.totalorder %v1675_v17, 0  ;;  %vm1695_vm4 = vcmp.lt.s32.totalorder %v1675_v17, 16 }
 0x2b0   : > { %2147 = vrot.lane.b32.xlu1 %v4776_v0, %s3215_s11  ;;  %2149 = vrot.lane.b32.xlu0 %v4779_v63, %s3215_s11  ;;  %vm1705_vm14 = vmand %vm1685_vm0, %vm1695_vm4  ;;  %v2002_v29 = vsel %vm708_vm3, %v1999_v7, %v2001_v23  ;;  %vm1686_vm15 = vcmp.ge.s32.totalorder %v1676_v3, 0  ;;  %vm1696_vm0 = vcmp.lt.s32.totalorder %v1676_v3, 16 }
 0x2b1   : > { %3064 = vmatprep.mubr.msk.f32.mxu1 %vm1436_vm13, %v2525_v60  ;;  %v2940_v32 = vsel %vm1705_vm14, 1.0, %v3222_v15  ;;  %vm1706_vm4 = vmand %vm1686_vm15, %vm1696_vm0 }
 0x2b2   : > { %v4807_v41 = vpop.permute.xlu1 %2181 }
 0x2b3   : > { %v4811_v8 = vpop.permute.xlu0 %2041 }
 0x2b4   : > { %2335 = vrot.lane.b32.xlu1 %v1960_v28, %s3219_s29  ;;  %2337 = vrot.lane.b32.xlu0 %v1962_v5, %s3219_s29 }
 0x2b6   : > { %v2370_v19 = vpop.permute.xlu1 %2369 }
 0x2b7   : > { %v2526_v22 = vsel %vm1410_vm12, %v2510_v16, %v2370_v19  ;;  %v4822_v11 = vpop.permute.xlu0 %2229 }
 0x2b8   : > { %2195 = vrot.lane.b32.xlu1 %v1960_v28, %s3216_s12  ;;  %2055 = vrot.lane.b32.xlu0 %v1960_v28, %s3213_s9 }
 0x2b9   : > { %3065 = vmatmul.mubr.msk.f32.gmra.mxu1 %vm1436_vm13, %v2526_v22 }
 0x2ba   : > { %v4830_v56 = vpop.permute.xlu1 %2087 }
 0x2bb   : > { %v4832_v12 = vpop.permute.xlu0 %2089 }
 0x2bc   : > { %2383 = vrot.lane.b32.xlu1 %v2000_v35, %s3220_s17  ;;  %2243 = vrot.lane.b32.xlu0 %v2000_v35, %s3217_s13 }
 0x2be   : > { %v2276_v49 = vpop.permute.xlu1 %2275 }
 0x2bf   : > { %v4837_v55 = vpop.permute.xlu0 %2277 }
 0x2c0   : > { %2197 = vrot.lane.b32.xlu1 %v1962_v5, %s3216_s12  ;;  %2057 = vrot.lane.b32.xlu0 %v1962_v5, %s3213_s9 }
 0x2c1   : > { %v3047_v45 = vpop.f32.mrf.mxu0 }
 0x2c2   : > { %v1745_v13 = vmul.f32 %v3047_v45, %v4279_v36  ;;  %v4842_v53 = vpop.permute.xlu1 %2135 }
 0x2c3   : > { %v1647_v4 = vpop.f32.mrf.mxu0  ;;  %v4845_v46 = vpop.permute.xlu0 %2137 }
 0x2c4   : > { %v1786_v38 = vadd.f32 %v4102_v34, %v1745_v13  ;;  %v1744_v60 = vmul.f32 %v4279_v36, %v1647_v4  ;;  %2385 = vrot.lane.b32.xlu1 %v2002_v29, %s3220_s17  ;;  %2245 = vrot.lane.b32.xlu0 %v2002_v29, %s3217_s13  ;;  %v2431_v34 = vsel %vm1284_vm6, %v2415_v25, %v4739_v57 }
 0x2c5   : > { %v2447_v9 = vsel %vm1305_vm7, %v2431_v34, %v4750_v43  ;;  %v2416_v4 = vsel %vm1263_vm5, %v4462_v27, %v4720_v47 }
 0x2c6   : > { %v1806_v10 = vmul.f32 %v2940_v32, %v1786_v38  ;;  %v1785_v50 = vadd.f32 %v4110_v2, %v1744_v60  ;;  %v2324_v58 = vpop.permute.xlu1 %2323  ;;  %v2463_v2 = vsel %vm1326_vm8, %v2447_v9, %v4769_v61 }
 0x2c7   : > { %v2326_v52 = vpop.permute.xlu0 %2325  ;;  %v2479_v57 = vsel %vm1347_vm9, %v2463_v2, %v4791_v40 }
 0x2c8   : > { %v1854_v54 = vrot.slane %v1806_v10, 7  ;;  %v1805_v31 = vmul.f32 %v2940_v32, %v1785_v50  ;;  %2103 = vrot.lane.b32.xlu1 %v2000_v35, %s3214_s10  ;;  %2105 = vrot.lane.b32.xlu0 %v2002_v29, %s3214_s10  ;;  %v2495_v18 = vsel %vm1368_vm10, %v2479_v57, %v2276_v49  ;;  %v2941_v29 = vsel %vm1706_vm4, 1.0, %v3222_v15 }
 0x2c9   : > { %v2511_v40 = vsel %vm1389_vm11, %v2495_v18, %v2324_v58  ;;  %v2432_v10 = vsel %vm1284_vm6, %v2416_v4, %v4741_v30 }
 0x2ca   : > { %v1905_v28 = vsel %vm542_vm1, %v1854_v54, 0.0  ;;  %v1853_v59 = vrot.slane %v1805_v31, 7  ;;  %v4866_v62 = vpop.permute.xlu1 %2183  ;;  %v2448_v15 = vsel %vm1305_vm7, %v2432_v10, %v4754_v33 }
 0x2cb   : > { %v4870_v5 = vpop.permute.xlu0 %2043  ;;  %v2008_v16 = vrot.slane %v1905_v28, 1  ;;  %v2013_v35 = vrot.slane %v1905_v28, 2  ;;  %v2464_v47 = vsel %vm1326_vm8, %v2448_v15, %v4807_v41 }
 0x2cc   : > { %v1895_v24 = vsel %vm542_vm1, 0.0, %v1853_v59  ;;  %v1855_v43 = vsel %vm542_vm1, %v1853_v59, %v1854_v54 }
 0x2cd   : > { %v2005_v19 = vrot.slane %v1895_v24, 1  ;;  %v2010_v61 = vrot.slane %v1895_v24, 2  ;;  %2291 = vrot.lane.b32.xlu1 %v1895_v24, %s3218_s14  ;;  %v2006_v22 = vrot.slane %v1855_v43, 1  ;;  %v2011_v37 = vrot.slane %v1855_v43, 2  ;;  %2293 = vrot.lane.b32.xlu0 %v1855_v43, %s3218_s14 }
 0x2ce   : > { %v3050_v7 = vpop.f32.mrf.mxu0  ;;  %v2372_v17 = vpop.permute.xlu1 %2371 }
 0x2cf   : > { %v1747_v49 = vmul.f32 %v3050_v7, %v4279_v36  ;;  %v2527_v45 = vsel %vm1410_vm12, %v2511_v40, %v2372_v17  ;;  %v4881_v23 = vpop.permute.xlu0 %2231  ;;  %v2007_v13 = vsel %vm657_vm2, %v2005_v19, %v2006_v22  ;;  %v2009_v32 = vsel %vm657_vm2, %v2006_v22, %v2008_v16 }
 0x2d0   : > { %v1657_v38 = vpop.f32.mrf.mxu0  ;;  %3067 = vmatprep.mubr.msk.f32.mxu1 %vm1436_vm13, %v2527_v45  ;;  %v2012_v60 = vsel %vm708_vm3, %v2010_v61, %v2011_v37  ;;  %v2014_v3 = vsel %vm708_vm3, %v2011_v37, %v2013_v35 }
 0x2d1   : > { %v1788_v50 = vadd.f32 %v4117_v51, %v1747_v49  ;;  %v1746_v58 = vmul.f32 %v4279_v36, %v1657_v38  ;;  %2151 = vrot.lane.b32.xlu1 %v1895_v24, %s3215_s11  ;;  %2153 = vrot.lane.b32.xlu0 %v1855_v43, %s3215_s11  ;;  %v2480_v51 = vsel %vm1347_vm9, %v2464_v47, %v4822_v11 }
 0x2d2   : > { %v4900_v27 = vpop.permute.xlu1 %2185  ;;  %v2496_v36 = vsel %vm1368_vm10, %v2480_v51, %v4837_v55 }
 0x2d3   : > { %v1808_v25 = vmul.f32 %v2941_v29, %v1788_v50  ;;  %v1787_v34 = vadd.f32 %v4127_v21, %v1746_v58  ;;  %v4905_v30 = vpop.permute.xlu0 %2045  ;;  %v2512_v33 = vsel %vm1389_vm11, %v2496_v36, %v2326_v52 }
 0x2d5   : > { %v1857_v54 = vrot.slane %v1808_v25, 7  ;;  %v1807_v31 = vmul.f32 %v2941_v29, %v1787_v34  ;;  %2339 = vrot.lane.b32.xlu1 %v2007_v13, %s3219_s29  ;;  %2341 = vrot.lane.b32.xlu0 %v2009_v32, %s3219_s29 }
 0x2d6   : > { %v2374_v41 = vpop.permute.xlu1 %2373 }
 0x2d7   : > { %v1906_v9 = vsel %vm542_vm1, %v1857_v54, 0.0  ;;  %v1856_v21 = vrot.slane %v1807_v31, 7  ;;  %v2528_v2 = vsel %vm1410_vm12, %v2512_v33, %v2374_v41  ;;  %v2234_v28 = vpop.permute.xlu0 %2233 }
 0x2d8   : > { %3068 = vmatmul.mubr.msk.f32.gmra.mxu1 %vm1436_vm13, %v2528_v2  ;;  %v2020_v59 = vrot.slane %v1906_v9, 1  ;;  %v2025_v19 = vrot.slane %v1906_v9, 2  ;;  %v2419_v2 = vsel %vm1263_vm5, %v4561_v48, %v4870_v5  ;;  %v2420_v5 = vsel %vm1263_vm5, %v4564_v42, %v4905_v30 }
 0x2d9   : > { %v1858_v11 = vsel %vm542_vm1, %v1856_v21, %v1857_v54  ;;  %2199 = vrot.lane.b32.xlu1 %v2007_v13, %s3216_s12  ;;  %2201 = vrot.lane.b32.xlu0 %v2009_v32, %s3216_s12  ;;  %v1896_v55 = vsel %vm542_vm1, 0.0, %v1856_v21  ;;  %v2417_v32 = vsel %vm1263_vm5, %v4520_v39, %v4773_v6 }
 0x2da   : > { %v4921_v57 = vpop.permute.xlu1 %2091  ;;  %v2017_v52 = vrot.slane %v1896_v55, 1  ;;  %v2022_v18 = vrot.slane %v1896_v55, 2  ;;  %v2018_v24 = vrot.slane %v1858_v11, 1  ;;  %v2023_v43 = vrot.slane %v1858_v11, 2 }
 0x2db   : > { %v4923_v16 = vpop.permute.xlu0 %2093  ;;  %v2433_v4 = vsel %vm1284_vm6, %v2417_v32, %v4830_v56 }
 0x2dc   : > { %v2019_v61 = vsel %vm657_vm2, %v2017_v52, %v2018_v24  ;;  %v2024_v22 = vsel %vm708_vm3, %v2022_v18, %v2023_v43  ;;  %v2021_v37 = vsel %vm657_vm2, %v2018_v24, %v2020_v59  ;;  %v2026_v40 = vsel %vm708_vm3, %v2023_v43, %v2025_v19 }
 0x2dd   : > { %2387 = vrot.lane.b32.xlu1 %v2012_v60, %s3220_s17  ;;  %2389 = vrot.lane.b32.xlu0 %v2014_v3, %s3220_s17  ;;  %v2449_v29 = vsel %vm1305_vm7, %v2433_v4, %v4842_v53  ;;  %v2418_v53 = vsel %vm1263_vm5, %v4523_v14, %v4811_v8 }
 0x2de   : > { %v2280_v7 = vpop.permute.xlu1 %2279 }
 0x2df   : > { %v2282_v17 = vpop.permute.xlu0 %2281 }
 0x2e1   : > { %2247 = vrot.lane.b32.xlu1 %v2012_v60, %s3217_s13  ;;  %2295 = vrot.lane.b32.xlu0 %v1896_v55, %s3218_s14  ;;  %v2465_v60 = vsel %vm1326_vm8, %v2449_v29, %v4866_v62  ;;  %v2434_v62 = vsel %vm1284_vm6, %v2418_v53, %v4832_v12 }
 0x2e2   : > { %v2140_v35 = vpop.permute.xlu1 %2139  ;;  %v2481_v10 = vsel %vm1347_vm9, %v2465_v60, %v4881_v23  ;;  %v2450_v23 = vsel %vm1305_vm7, %v2434_v62, %v4845_v46 }
 0x2e3   : > { %v2142_v49 = vpop.permute.xlu0 %2141  ;;  %v2497_v39 = vsel %vm1368_vm10, %v2481_v10, %v2280_v7  ;;  %v2466_v47 = vsel %vm1326_vm8, %v2450_v23, %v4900_v27 }
 0x2e4   : > { %v2482_v34 = vsel %vm1347_vm9, %v2466_v47, %v2234_v28  ;;  %v2435_v28 = vsel %vm1284_vm6, %v2419_v2, %v4921_v57  ;;  %v2436_v57 = vsel %vm1284_vm6, %v2420_v5, %v4923_v16 }
 0x2e5   : > { %2249 = vrot.lane.b32.xlu1 %v2014_v3, %s3217_s13  ;;  %2343 = vrot.lane.b32.xlu0 %v2019_v61, %s3219_s29  ;;  %v2498_v14 = vsel %vm1368_vm10, %v2482_v34, %v2282_v17 }
 0x2e6   : > { %v2328_v45 = vpop.permute.xlu1 %2327 }
 0x2e7   : > { %v2330_v13 = vpop.permute.xlu0 %2329  ;;  %v2513_v6 = vsel %vm1389_vm11, %v2497_v39, %v2328_v45 }
 0x2e8   : > { %v2514_v8 = vsel %vm1389_vm11, %v2498_v14, %v2330_v13 }
 0x2e9   : > { %2297 = vrot.lane.b32.xlu1 %v1858_v11, %s3218_s14  ;;  %2391 = vrot.lane.b32.xlu0 %v2024_v22, %s3220_s17  ;;  %v2451_v11 = vsel %vm1305_vm7, %v2435_v28, %v2140_v35  ;;  %v2452_v22 = vsel %vm1305_vm7, %v2436_v57, %v2142_v49 }
 0x2ea   : > { %v2188_v38 = vpop.permute.xlu1 %2187 }
 0x2eb   : > { %v4946_v3 = vpop.permute.xlu0 %2047  ;;  %v2467_v59 = vsel %vm1326_vm8, %v2451_v11, %v2188_v38 }
 0x2ec   : > { %v2421_v39 = vsel %vm1263_vm5, %v4618_v44, %v4946_v3 }
 0x2ed   : > { %2345 = vrot.lane.b32.xlu1 %v2021_v37, %s3219_s29 }
 0x2ee   : > { %v2376_v56 = vpop.permute.xlu1 %2375 }
 0x2ef   : > { %v2529_v50 = vsel %vm1410_vm12, %v2513_v6, %v2376_v56  ;;  %v2236_v58 = vpop.permute.xlu0 %2235 }
 0x2f0   : > { %3070 = vmatprep.mubr.msk.f32.mxu1 %vm1436_vm13, %v2529_v50  ;;  %v2483_v18 = vsel %vm1347_vm9, %v2467_v59, %v2236_v58 }
 0x2f1   : > { %2393 = vrot.lane.b32.xlu1 %v2026_v40, %s3220_s17 }
 0x2f2   : > { %v2190_v15 = vpop.permute.xlu1 %2189 }
 0x2f3   : > { %v4965_v25 = vpop.permute.xlu0 %2049  ;;  %v2468_v40 = vsel %vm1326_vm8, %v2452_v22, %v2190_v15 }
 0x2f4   : > { %v2422_v44 = vsel %vm1263_vm5, %v4621_v20, %v4965_v25 }
 0x2f6   : > { %v2378_v51 = vpop.permute.xlu1 %2377 }
 0x2f7   : > { %v2530_v12 = vsel %vm1410_vm12, %v2514_v8, %v2378_v51  ;;  %v2238_v36 = vpop.permute.xlu0 %2237 }
 0x2f8   : > { %3071 = vmatmul.mubr.msk.f32.gmra.mxu1 %vm1436_vm13, %v2530_v12  ;;  %v2484_v17 = vsel %vm1347_vm9, %v2468_v40, %v2238_v36 }
 0x2fa   : > { %v2096_v54 = vpop.permute.xlu1 %2095 }
 0x2fb   : > { %v2098_v46 = vpop.permute.xlu0 %2097  ;;  %v2437_v6 = vsel %vm1284_vm6, %v2421_v39, %v2096_v54 }
 0x2fc   : > { %v2438_v3 = vsel %vm1284_vm6, %v2422_v44, %v2098_v46 }
 0x2fe   : > { %v2284_v31 = vpop.permute.xlu1 %2283 }
 0x2ff   : > { %v2286_v33 = vpop.permute.xlu0 %2285  ;;  %v2499_v24 = vsel %vm1368_vm10, %v2483_v18, %v2284_v31 }
 0x300   : > { %v2500_v35 = vsel %vm1368_vm10, %v2484_v17, %v2286_v33 }
 0x302   : > { %v2144_v41 = vpop.permute.xlu1 %2143 }
 0x303   : > { %v2146_v27 = vpop.permute.xlu0 %2145  ;;  %v2453_v56 = vsel %vm1305_vm7, %v2437_v6, %v2144_v41 }
 0x304   : > { %v2454_v8 = vsel %vm1305_vm7, %v2438_v3, %v2146_v27 }
 0x306   : > { %v2332_v9 = vpop.permute.xlu1 %2331 }
 0x307   : > { %v2334_v21 = vpop.permute.xlu0 %2333  ;;  %v2515_v43 = vsel %vm1389_vm11, %v2499_v24, %v2332_v9 }
 0x308   : > { %v2516_v45 = vsel %vm1389_vm11, %v2500_v35, %v2334_v21 }
 0x30a   : > { %v2192_v55 = vpop.permute.xlu1 %2191 }
 0x30b   : > { %v4979_v52 = vpop.permute.xlu0 %2051  ;;  %v2469_v58 = vsel %vm1326_vm8, %v2453_v56, %v2192_v55 }
 0x30c   : > { %v2423_v59 = vsel %vm1263_vm5, %v4686_v26, %v4979_v52 }
 0x30e   : > { %v2380_v19 = vpop.permute.xlu1 %2379 }
 0x30f   : > { %v2531_v61 = vsel %vm1410_vm12, %v2515_v43, %v2380_v19  ;;  %v2240_v48 = vpop.permute.xlu0 %2239 }
 0x310   : > { %3073 = vmatprep.mubr.msk.f32.mxu1 %vm1436_vm13, %v2531_v61  ;;  %v2485_v62 = vsel %vm1347_vm9, %v2469_v58, %v2240_v48 }
 0x312   : > { %v2194_v37 = vpop.permute.xlu1 %2193 }
 0x313   : > { %v2054_v7 = vpop.permute.xlu0 %2053  ;;  %v2470_v12 = vsel %vm1326_vm8, %v2454_v8, %v2194_v37 }
 0x314   : > { %v2424_v18 = vsel %vm1263_vm5, %v4689_v1, %v2054_v7 }
 0x316   : > { %v2382_v13 = vpop.permute.xlu1 %2381 }
 0x317   : > { %v2532_v42 = vsel %vm1410_vm12, %v2516_v45, %v2382_v13  ;;  %v2242_v30 = vpop.permute.xlu0 %2241 }
 0x318   : > { %3074 = vmatmul.mubr.msk.f32.gmra.mxu1 %vm1436_vm13, %v2532_v42  ;;  %v2486_v54 = vsel %vm1347_vm9, %v2470_v12, %v2242_v30 }
 0x31a   : > { %v2100_v32 = vpop.permute.xlu1 %2099 }
 0x31b   : > { %v2102_v16 = vpop.permute.xlu0 %2101  ;;  %v2439_v24 = vsel %vm1284_vm6, %v2423_v59, %v2100_v32 }
 0x31c   : > { %v2440_v43 = vsel %vm1284_vm6, %v2424_v18, %v2102_v16 }
 0x31e   : > { %v2288_v4 = vpop.permute.xlu1 %2287 }
 0x31f   : > { %v2290_v49 = vpop.permute.xlu0 %2289  ;;  %v2501_v23 = vsel %vm1368_vm10, %v2485_v62, %v2288_v4 }
 0x320   : > { %v2502_v31 = vsel %vm1368_vm10, %v2486_v54, %v2290_v49 }
 0x322   : > { %v2148_v29 = vpop.permute.xlu1 %2147 }
 0x323   : > { %v2150_v38 = vpop.permute.xlu0 %2149  ;;  %v2455_v19 = vsel %vm1305_vm7, %v2439_v24, %v2148_v29 }
 0x324   : > { %v2456_v61 = vsel %vm1305_vm7, %v2440_v43, %v2150_v38 }
 0x326   : > { %v2336_v60 = vpop.permute.xlu1 %2335 }
 0x327   : > { %v2338_v10 = vpop.permute.xlu0 %2337  ;;  %v2517_v15 = vsel %vm1389_vm11, %v2501_v23, %v2336_v60 }
 0x328   : > { %v2518_v33 = vsel %vm1389_vm11, %v2502_v31, %v2338_v10 }
 0x32a   : > { %v2196_v50 = vpop.permute.xlu1 %2195 }
 0x32b   : > { %v2056_v53 = vpop.permute.xlu0 %2055  ;;  %v2471_v57 = vsel %vm1326_vm8, %v2455_v19, %v2196_v50 }
 0x32c   : > { %v2425_v32 = vsel %vm1263_vm5, %v4776_v0, %v2056_v53 }
 0x32e   : > { %v2384_v47 = vpop.permute.xlu1 %2383 }
 0x32f   : > { %v2533_v34 = vsel %vm1410_vm12, %v2517_v15, %v2384_v47  ;;  %v2244_v14 = vpop.permute.xlu0 %2243 }
 0x330   : > { %3076 = vmatprep.mubr.msk.f32.mxu1 %vm1436_vm13, %v2533_v34  ;;  %v2487_v37 = vsel %vm1347_vm9, %v2471_v57, %v2244_v14 }
 0x332   : > { %v2198_v51 = vpop.permute.xlu1 %2197 }
 0x333   : > { %v2058_v36 = vpop.permute.xlu0 %2057  ;;  %v2472_v22 = vsel %vm1326_vm8, %v2456_v61, %v2198_v51 }
 0x334   : > { %v2426_v58 = vsel %vm1263_vm5, %v4779_v63, %v2058_v36 }
 0x336   : > { %v2386_v41 = vpop.permute.xlu1 %2385 }
 0x337   : > { %v2534_v9 = vsel %vm1410_vm12, %v2518_v33, %v2386_v41  ;;  %v2246_v20 = vpop.permute.xlu0 %2245 }
 0x338   : > { %3077 = vmatmul.mubr.msk.f32.gmra.mxu1 %vm1436_vm13, %v2534_v9  ;;  %v2488_v26 = vsel %vm1347_vm9, %v2472_v22, %v2246_v20 }
 0x33a   : > { %v2104_v25 = vpop.permute.xlu1 %2103 }
 0x33b   : > { %v2106_v46 = vpop.permute.xlu0 %2105  ;;  %v2441_v16 = vsel %vm1284_vm6, %v2425_v32, %v2104_v25 }
 0x33c   : > { %v2442_v62 = vsel %vm1284_vm6, %v2426_v58, %v2106_v46 }
 0x33f   : > { %v2292_v21 = vpop.permute.xlu1 %2291  ;;  %v2294_v27 = vpop.permute.xlu0 %2293 }
 0x340   : > { %v2503_v1 = vsel %vm1368_vm10, %v2487_v37, %v2292_v21  ;;  %v2504_v52 = vsel %vm1368_vm10, %v2488_v26, %v2294_v27 }
 0x343   : > { %v2152_v2 = vpop.permute.xlu1 %2151  ;;  %v2154_v28 = vpop.permute.xlu0 %2153 }
 0x344   : > { %v2457_v4 = vsel %vm1305_vm7, %v2441_v16, %v2152_v2  ;;  %v2458_v23 = vsel %vm1305_vm7, %v2442_v62, %v2154_v28 }
 0x347   : > { %v2340_v11 = vpop.permute.xlu1 %2339  ;;  %v2342_v55 = vpop.permute.xlu0 %2341 }
 0x348   : > { %v2519_v40 = vsel %vm1389_vm11, %v2503_v1, %v2340_v11  ;;  %v2520_v7 = vsel %vm1389_vm11, %v2504_v52, %v2342_v55 }
 0x34b   : > { %v2200_v48 = vpop.permute.xlu1 %2199  ;;  %v2202_v5 = vpop.permute.xlu0 %2201 }
 0x34c   : > { %v2473_v49 = vsel %vm1326_vm8, %v2457_v4, %v2200_v48  ;;  %v2474_v47 = vsel %vm1326_vm8, %v2458_v23, %v2202_v5 }
 0x34f   : > { %v2388_v17 = vpop.permute.xlu1 %2387  ;;  %v2390_v35 = vpop.permute.xlu0 %2389 }
 0x350   : > { %v2535_v45 = vsel %vm1410_vm12, %v2519_v40, %v2388_v17  ;;  %v2536_v13 = vsel %vm1410_vm12, %v2520_v7, %v2390_v35 }
 0x351   : > { %3079 = vmatprep.mubr.msk.f32.mxu1 %vm1436_vm13, %v2535_v45 }
 0x352   : > { %3080 = vmatmul.mubr.msk.f32.gmra.mxu1 %vm1436_vm13, %v2536_v13 }
 0x353   : > { %v2248_v42 = vpop.permute.xlu1 %2247  ;;  %v2296_v30 = vpop.permute.xlu0 %2295 }
 0x354   : > { %v2489_v60 = vsel %vm1347_vm9, %v2473_v49, %v2248_v42 }
 0x355   : > { %v2505_v39 = vsel %vm1368_vm10, %v2489_v60, %v2296_v30 }
 0x357   : > { %v2250_v29 = vpop.permute.xlu1 %2249  ;;  %v2344_v38 = vpop.permute.xlu0 %2343 }
 0x358   : > { %v2521_v50 = vsel %vm1389_vm11, %v2505_v39, %v2344_v38  ;;  %v2490_v34 = vsel %vm1347_vm9, %v2474_v47, %v2250_v29 }
 0x359   : > { %v3063_v10 = vpop.f32.mrf.mxu1 }
 0x35a   : > { %2741 = vst.msk [vmem:[%s3329_s6 + $0x8] sm:$0xff] %vm1263_vm5, %v3063_v10 }
 0x35b   : > { %v2298_v6 = vpop.permute.xlu1 %2297  ;;  %v2661_v56 = vpop.f32.mrf.mxu1 }
 0x35c   : > { %2740 = vst.msk [vmem:[%s3329_s6] sm:$0xff] %vm1263_vm5, %v2661_v56  ;;  %v2392_v0 = vpop.permute.xlu0 %2391  ;;  %v2506_v14 = vsel %vm1368_vm10, %v2490_v34, %v2298_v6 }
 0x35d   : > { %v2537_v53 = vsel %vm1410_vm12, %v2521_v50, %v2392_v0 }
 0x35e   : > { %3082 = vmatprep.mubr.msk.f32.mxu1 %vm1436_vm13, %v2537_v53 }
 0x35f   : > { %v2346_v15 = vpop.permute.xlu1 %2345 }
 0x360   : > { %v2522_v63 = vsel %vm1389_vm11, %v2506_v14, %v2346_v15 }
 0x363   : > { %v2394_v44 = vpop.permute.xlu1 %2393 }
 0x364   : > { %v2538_v3 = vsel %vm1410_vm12, %v2522_v63, %v2394_v44 }
 0x365   : > { %3083 = vmatmul.mubr.msk.f32.gmra.mxu1 %vm1436_vm13, %v2538_v3 }
 0x379   : > { %v3066_v8 = vpop.f32.mrf.mxu1 }
 0x37a   : > { %2743 = vst.msk [vmem:[%s3329_s6 + $0x18] sm:$0xff] %vm1263_vm5, %v3066_v8 }
 0x37b   : > { %v2671_v51 = vpop.f32.mrf.mxu1 }
 0x37c   : > { %2742 = vst.msk [vmem:[%s3329_s6 + $0x10] sm:$0xff] %vm1263_vm5, %v2671_v51 }
 0x398   : > { %v3069_v12 = vpop.f32.mrf.mxu1 }
 0x399   : > { %2745 = vst.msk [vmem:[%s3329_s6 + $0x28] sm:$0xff] %vm1263_vm5, %v3069_v12 }
 0x39a   : > { %v2681_v36 = vpop.f32.mrf.mxu1 }
 0x39b   : > { %2744 = vst.msk [vmem:[%s3329_s6 + $0x20] sm:$0xff] %vm1263_vm5, %v2681_v36 }
 0x3b8   : > { %v3072_v54 = vpop.f32.mrf.mxu1 }
 0x3b9   : > { %2747 = vst.msk [vmem:[%s3329_s6 + $0x38] sm:$0xff] %vm1263_vm5, %v3072_v54 }
 0x3ba   : > { %v2691_v31 = vpop.f32.mrf.mxu1 }
 0x3bb   : > { %2746 = vst.msk [vmem:[%s3329_s6 + $0x30] sm:$0xff] %vm1263_vm5, %v2691_v31 }
 0x3d8   : > { %v3075_v33 = vpop.f32.mrf.mxu1 }
 0x3d9   : > { %2749 = vst.msk [vmem:[%s3329_s6 + $0x48] sm:$0xff] %vm1263_vm5, %v3075_v33 }
 0x3da   : > { %v2701_v41 = vpop.f32.mrf.mxu1 }
 0x3db   : > { %2748 = vst.msk [vmem:[%s3329_s6 + $0x40] sm:$0xff] %vm1263_vm5, %v2701_v41 }
 0x3f8   : > { %v3078_v9 = vpop.f32.mrf.mxu1 }
 0x3f9   : > { %2751 = vst.msk [vmem:[%s3329_s6 + $0x58] sm:$0xff] %vm1263_vm5, %v3078_v9 }
 0x3fa   : > { %v2711_v20 = vpop.f32.mrf.mxu1 }
 0x3fb   : > { %2750 = vst.msk [vmem:[%s3329_s6 + $0x50] sm:$0xff] %vm1263_vm5, %v2711_v20 }
 0x412   : > { %v3081_v25 = vpop.f32.mrf.mxu1 }
 0x413   : > { %2753 = vst.msk [vmem:[%s3329_s6 + $0x68] sm:$0xff] %vm1263_vm5, %v3081_v25 }
 0x414   : > { %v2721_v46 = vpop.f32.mrf.mxu1 }
 0x415   : > { %2752 = vst.msk [vmem:[%s3329_s6 + $0x60] sm:$0xff] %vm1263_vm5, %v2721_v46 }
 0x425   : > { %v3084_v21 = vpop.f32.mrf.mxu1 }
 0x426   : > { %2755 = vst.msk [vmem:[%s3329_s6 + $0x78] sm:$0xff] %vm1263_vm5, %v3084_v21 }
 0x427   : > { %v2731_v27 = vpop.f32.mrf.mxu1 }
 0x428   : > { %2754 = vst.msk [vmem:[%s3329_s6 + $0x70] sm:$0xff] %vm1263_vm5, %v2731_v27 }
 0x429 PF: > { %s16_s22 = sadd.s32 1, %s3209_s22   ;;  %s5126_s18 = smov %s3201_s20 }
 0x42a   : > { %p13_p5 = scmp.ge.s32.totalorder %s16_s22, 6   ;;  %s5127_s19 = smov %s3205_s21 }
 0x42b   : > { %s5128_s20 = smov %s5131_s24  ;;  %s5129_s21 = smov %s5135_s25 }
 0x42c   :  { %15 = sbr.rel (!%p13_p5) target bundleno = 3 (0x3), region = 86 }
 0x431   :  { %2788 = vsyncpa [#allocation4], 1 }
 0x432   :  { %2790 = vsyncpa [#allocation4 + $0x1], 1 }

</bundles_post_ra>
